<compile_context>
chip_gen: v6e
topology: v6e:2x2x1
jax: 0.10.0
libtpu: 0.0.40
codegen_flags: <defaults>
</compile_context>

<pallas_src>
import jax
import jax.numpy as jnp
from jax.experimental import pallas as pl
from jax.experimental.pallas import tpu as pltpu

CIN = 160
COUT = 3840


def _num_output_tiles():
    """Grid width: 2 on v7x (one weight half per TensorCore), else 1."""
    try:
        kind = jax.devices()[0].device_kind.lower()
    except Exception:
        kind = ""
    return 2 if "v7" in kind else 1


def conv1x1_sigmoid_kernel(x_ref, w_ref, b_ref, o_ref):
    # x_ref: (N, CIN) bf16 ; w_ref: (CIN, TN) bf16 ; b_ref: (1, TN) f32
    # o_ref: (N, TN) f32
    # Natural (M,K)@(K,N) MXU matmul -> no in-kernel transpose of the weight
    # tile; lane-dense output; f32 accumulation.
    y = jnp.dot(x_ref[...], w_ref[...], preferred_element_type=jnp.float32)
    y = y + b_ref[...]
    o_ref[...] = jax.nn.sigmoid(y).astype(o_ref.dtype)


def prepare_params(weight, bias, compute_dtype=jnp.bfloat16):
    """One-time (parameter-load time) layout + dtype preparation.

    weight: (COUT, CIN, 1, 1) f32  ->  (CIN, COUT) in `compute_dtype`
    bias:   (COUT,)          f32  ->  (1, COUT) f32 (kept f32: tiny DMA,
                                       added post-accumulation)
    Keeping this out of the per-call path avoids a 2.4 MB transpose/cast
    HBM round-trip on every invocation.
    """
    cout, cin = weight.shape[0], weight.shape[1]
    w_t = weight.reshape(cout, cin).T.astype(compute_dtype)      # (CIN, COUT)
    b2d = bias.reshape(1, cout).astype(jnp.float32)              # (1, COUT)
    return jnp.asarray(w_t), jnp.asarray(b2d)


def conv1x1_sigmoid(x_nchw, w_t, b2d, *, num_tiles=None):
    """x_nchw: (N, CIN, 1, 1) f32; w_t: (CIN, COUT); b2d: (1, COUT) f32."""
    n, cin, h, w = x_nchw.shape
    assert (h, w) == (1, 1)
    cin_w, cout = w_t.shape
    assert cin_w == cin

    if num_tiles is None:
        num_tiles = _num_output_tiles()
    assert cout % num_tiles == 0
    tn = cout // num_tiles
    assert tn % 128 == 0  # lane-dense output tiles / (8,128) rule

    # Feed the MXU in the weight's compute dtype (bf16): negligible cast of
    # the 160-element activation, native bf16 x bf16 -> f32 matmul.
    x2d = x_nchw.reshape(n, cin).astype(w_t.dtype)

    itemsize_w = jnp.dtype(w_t.dtype).itemsize
    itemsize_x = jnp.dtype(x2d.dtype).itemsize
    itemsize_b = jnp.dtype(b2d.dtype).itemsize
    cost = pl.CostEstimate(
        flops=2 * n * cin * cout,
        transcendentals=n * cout,
        bytes_accessed=(cin * cout * itemsize_w
                        + n * cin * itemsize_x
                        + cout * itemsize_b
                        + n * cout * 4),
    )

    out = pl.pallas_call(
        conv1x1_sigmoid_kernel,
        out_shape=jax.ShapeDtypeStruct((n, cout), jnp.float32),
        grid_spec=pltpu.PrefetchScalarGridSpec(
            num_scalar_prefetch=0,
            grid=(num_tiles,),
            in_specs=[
                pl.BlockSpec((n, cin), lambda j: (0, 0)),    # x, resident
                pl.BlockSpec((cin, tn), lambda j: (0, j)),   # weight tile (K,N)
                pl.BlockSpec((1, tn), lambda j: (0, j)),     # bias tile
            ],
            out_specs=pl.BlockSpec((n, tn), lambda j: (0, j)),
        ),
        compiler_params=pltpu.CompilerParams(
            dimension_semantics=("parallel",),
        ),
        cost_estimate=cost,
    )(x2d, w_t, b2d)

    return out.reshape(n, cout, 1, 1)     # back to NCHW


def reference(x_nchw, weight, bias):
    n, cin, _, _ = x_nchw.shape
    cout = weight.shape[0]
    y = x_nchw.reshape(n, cin) @ weight.reshape(cout, cin).T + bias[None, :]
    return jax.nn.sigmoid(y).reshape(n, cout, 1, 1)


if __name__ == "__main__":
    key = jax.random.PRNGKey(0)
    kx, kw, kb = jax.random.split(key, 3)

    # Input matching the module: [1, 160, 1, 1]
    x = jax.random.normal(kx, (1, CIN, 1, 1), dtype=jnp.float32)

    # Deterministic parameter init (PyTorch-like uniform ~ 1/sqrt(fan_in))
    bound = 1.0 / (CIN ** 0.5)
    weight = jax.random.uniform(kw, (COUT, CIN, 1, 1), jnp.float32, -bound, bound)
    bias = jax.random.uniform(kb, (COUT,), jnp.float32, -bound, bound)

    # One-time parameter preparation (layout + bf16 cast), then the call.
    w_t, b2d = prepare_params(weight, bias)
    out = conv1x1_sigmoid(x, w_t, b2d)
    out = jax.block_until_ready(out)

    ref = reference(x, weight, bias)
    assert out.shape == (1, COUT, 1, 1)
    # bf16 weight stream -> slightly looser tolerance (sigmoid output in [0,1]).
    max_err = float(jnp.max(jnp.abs(out - ref)))
    assert jnp.allclose(out, ref, atol=5e-3, rtol=0.0), max_err

    print("KERNEL_OK")
</pallas_src>

<mosaic_0001>
module attributes {stable_mosaic.version = 11 : i64} {
  func.func @conv1x1_sigmoid_kernel(%arg0: i32, %arg1: memref<1x160xbf16, #tpu.memory_space<vmem>>, %arg2: memref<160x3840xbf16, #tpu.memory_space<vmem>>, %arg3: memref<1x3840xf32, #tpu.memory_space<vmem>>, %arg4: memref<1x3840xf32, #tpu.memory_space<vmem>>) attributes {dimension_semantics = [#tpu.dimension_semantics<parallel>], iteration_bounds = array<i64: 1>, scalar_prefetch = 0 : i64, scratch_operands = 0 : i64, tpu.core_type = #tpu.core_type<tc>, window_params = [{pipeline_mode = #tpu.pipeline_mode<synchronous>, transform_indices = @transform_0, window_bounds = array<i64: 1, 160>}, {transform_indices = @transform_1, window_bounds = array<i64: 160, 3840>}, {transform_indices = @transform_2, window_bounds = array<i64: 1, 3840>}, {transform_indices = @transform_3, window_bounds = array<i64: 1, 3840>}]} {
    %c0 = arith.constant 0 : index
    %c0_0 = arith.constant 0 : index
    %0 = vector.load %arg1[%c0, %c0_0] : memref<1x160xbf16, #tpu.memory_space<vmem>>, vector<1x160xbf16>
    %c0_1 = arith.constant 0 : index
    %c0_2 = arith.constant 0 : index
    %1 = vector.load %arg2[%c0_1, %c0_2] : memref<160x3840xbf16, #tpu.memory_space<vmem>>, vector<160x3840xbf16>
    %cst = arith.constant dense<0.000000e+00> : vector<1x3840xf32>
    %2 = tpu.matmul %0, %1, %cst {dimension_numbers = #tpu.dot_dimension_numbers<[1], [0], [0], [1], [0, 0, 1, 1], [], []>} : vector<1x160xbf16>, vector<160x3840xbf16>, vector<1x3840xf32> -> vector<1x3840xf32>
    %c0_3 = arith.constant 0 : index
    %c0_4 = arith.constant 0 : index
    %3 = vector.load %arg3[%c0_3, %c0_4] : memref<1x3840xf32, #tpu.memory_space<vmem>>, vector<1x3840xf32>
    %4 = arith.addf %2, %3 : vector<1x3840xf32>
    %5 = arith.negf %4 : vector<1x3840xf32>
    %6 = math.exp %5 : vector<1x3840xf32>
    %cst_5 = arith.constant 1.000000e+00 : f32
    %7 = vector.broadcast %cst_5 : f32 to vector<1x3840xf32>
    %8 = arith.addf %7, %6 : vector<1x3840xf32>
    %9 = arith.divf %7, %8 : vector<1x3840xf32>
    %c0_6 = arith.constant 0 : index
    %c0_7 = arith.constant 0 : index
    %10 = vector.load %arg4[%c0_6, %c0_7] : memref<1x3840xf32, #tpu.memory_space<vmem>>, vector<1x3840xf32>
    tpu.vector_store %arg4[%c0_6, %c0_7], %9 {strides = array<i32>} : memref<1x3840xf32, #tpu.memory_space<vmem>>, vector<1x3840xf32>,
    return
  }
  func.func @transform_0(%arg0: i32) -> (i32, i32) {
    %c0_i32 = arith.constant 0 : i32
    %c0_i32_0 = arith.constant 0 : i32
    %c0_i32_1 = arith.constant 0 : i32
    return %c0_i32, %c0_i32_0 : i32, i32
  }
  func.func @transform_1(%arg0: i32) -> (i32, i32) {
    %c0_i32 = arith.constant 0 : i32
    %c0_i32_0 = arith.constant 0 : i32
    return %c0_i32, %arg0 : i32, i32
  }
  func.func @transform_2(%arg0: i32) -> (i32, i32) {
    %c0_i32 = arith.constant 0 : i32
    %c0_i32_0 = arith.constant 0 : i32
    return %c0_i32, %arg0 : i32, i32
  }
  func.func @transform_3(%arg0: i32) -> (i32, i32) {
    %c0_i32 = arith.constant 0 : i32
    %c0_i32_0 = arith.constant 0 : i32
    return %c0_i32, %arg0 : i32, i32
  }
}

</mosaic_0001>

<bundles_post_ra>
// kernel: tpu_custom_call.1
= control target key start
LH: loop header
LB: loop body
LE: loop exit
PB: predicated region body
PF: predicated region fallthrough
CT: control target
= control target key end

     0   :  { %8 = vsyncpa [#allocation3], 0  ;;  %s4285_s0 = inlined_call_operand.hbm [shape: bf16[1,160], index: 0, kind: input, shape index: {}]   ;;  %s4286_s1 = inlined_call_operand.hbm [shape: bf16[160,3840], index: 1, kind: input, shape index: {}]   ;;  %s4287_s2 = inlined_call_operand.hbm [shape: f32[1,3840], index: 2, kind: input, shape index: {}]   ;;  %s4288_s3 = inlined_call_operand.hbm [shape: f32[1,3840], index: 3, kind: output, shape index: {}]  }
   0x1   :  { %9 = vsyncpa [#allocation6], 0 }
   0x2   :  { %10 = vsyncpa [#allocation4], 0  ;;  %s4089_s12 = smov [#allocation5]  }
   0x3   :  { %s26_s13 = sshll.u32 %s4089_s12, 4  ;;  %s27_s13 = int_to_ptr.vmem [resolvable:$true] %s26_s13 }
   0x4   :  { %s4011_s14 = scalar_lea.vmem %s27_s13, 38400  ;;  %p4016_p1 = scmp.lt.s32.totalorder %s27_s13, %s27_s13 }
   0x5   :  { %p4012_p0 = scmp.ne.s32.totalorder %s27_s13, %s4011_s14  ;;  %p4017_p2 = scmp.lt.s32.totalorder %s4011_s14, %s4011_s14 }
   0x7   :  { %p4018_p3 = por %p4017_p2, %p4016_p1 }
   0x9   :  { %p4019_p4 = pnand %p4018_p3, %p4012_p0 }
   0xb   :  { %4022 = shalt.err (!%p4019_p4)
}
   0xc   :  { %s4090_s15 = smov 1920   ;;  %s4091_s16 = smov 120  }
   0xd   :  { %32 = dma.hbm_to_vmem [thread:$0]  %s4286_s1, 38400, %s27_s13, [#allocation6], %s4090_s15, %s4090_s15, %s4091_s16  }
   0xe   :  { %s4092_s19 = smov [#allocation2]   ;;  %s4093_s21 = smov [#allocation7]  }
   0xf   :  { %s17_s20 = sshll.u32 %s4092_s19, 4  ;;  %s39_s22 = sshll.u32 %s4093_s21, 4  ;;  %s18_s20 = int_to_ptr.vmem [resolvable:$true] %s17_s20  ;;  %s40_s22 = int_to_ptr.vmem [resolvable:$true] %s39_s22 }
  0x10   :  { %s4031_s23 = scalar_lea.vmem %s18_s20, 32  ;;  %p4036_p6 = scmp.lt.s32.totalorder %s18_s20, %s18_s20 }
  0x11   :  { %p4032_p5 = scmp.ne.s32.totalorder %s18_s20, %s4031_s23  ;;  %p4037_p7 = scmp.lt.s32.totalorder %s4031_s23, %s4031_s23 }
  0x13   :  { %p4038_p8 = por %p4037_p7, %p4036_p6 }
  0x15   :  { %p4039_p9 = pnand %p4038_p8, %p4032_p5 }
  0x17   :  { %4042 = shalt.err (!%p4039_p9)
}
  0x18   :  { %20 = dma.hbm_to_vmem [thread:$0]  %s4285_s0, 32, %s18_s20, [#allocation3]  }
  0x19   :  { %s4051_s26 = scalar_lea.vmem %s40_s22, 480  ;;  %p4056_p11 = scmp.lt.s32.totalorder %s40_s22, %s40_s22 }
  0x1a   :  { %p4052_p10 = scmp.ne.s32.totalorder %s40_s22, %s4051_s26  ;;  %p4057_p12 = scmp.lt.s32.totalorder %s4051_s26, %s4051_s26 }
  0x1c   :  { %p4058_p13 = por %p4057_p12, %p4056_p11 }
  0x1e   :  { %p4059_p0 = pnand %p4058_p13, %p4052_p10 }
  0x20   :  { %4062 = shalt.err (!%p4059_p0)
}
  0x21   :  { %42 = dma.hbm_to_vmem [thread:$0]  %s4287_s2, 480, %s40_s22, [#allocation6]  }
  0x22   :  { %4083 = dma.done.wait [#allocation3], 32  }
  0x23   :  { %4084 = vsyncadd [#allocation3], 4294967264 }
  0x24   :  { %4085 = dma.done.wait [#allocation6], 38880  }
  0x25   :  { %4086 = vsyncadd [#allocation6], 4294928416  ;;  %v3433_v0 = vld [vmem:[#allocation5 + $0x694] ss:$120 sps:$4 sm:$0xff]   ;;  %v3437_v2 = vld [vmem:[#allocation5 + $0x690] ss:$120 sps:$4 sm:$0xff]   ;;  %v370_v24 = vlaneseq }
  0x26   :  { %v3435_v1 = vld [vmem:[#allocation5 + $0x69c] ss:$120 sps:$4 sm:$0xff]   ;;  %2040 = vmatprep.subr.bf16.mxu0 %v3433_v0  ;;  %v3438_v3 = vld [vmem:[#allocation5 + $0x698] ss:$120 sps:$4 sm:$0xff]   ;;  %v3441_v5 = vld [vmem:[#allocation5 + $0x5ac] ss:$120 sps:$4 sm:$0xff]  }
  0x27   :  { %2081 = vmatprep.subr.bf16.mxu1 %v3435_v1  ;;  %v3439_v4 = vld [vmem:[#allocation5 + $0x5a4] ss:$120 sps:$4 sm:$0xff]   ;;  %2041 = vmatpush1.bf16.msra.mxu0 %v3437_v2  ;;  %v3443_v6 = vld [vmem:[#allocation5 + $0x5a0] ss:$120 sps:$4 sm:$0xff]   ;;  %v3445_v8 = vld [vmem:[#allocation5 + $0x4b4] ss:$120 sps:$4 sm:$0xff]  }
  0x28   :  { %2082 = vmatpush1.bf16.msra.mxu1 %v3438_v3  ;;  %2042 = vmatprep.subr.bf16.mxu0 %v3439_v4  ;;  %v3444_v7 = vld [vmem:[#allocation5 + $0x5a8] ss:$120 sps:$4 sm:$0xff]   ;;  %v3447_v9 = vld [vmem:[#allocation5 + $0x4bc] ss:$120 sps:$4 sm:$0xff]   ;;  %v3450_v11 = vld [vmem:[#allocation5 + $0x4b8] ss:$120 sps:$4 sm:$0xff]  }
  0x29   :  { %2083 = vmatprep.subr.bf16.mxu1 %v3441_v5  ;;  %v3449_v10 = vld [vmem:[#allocation5 + $0x4b0] ss:$120 sps:$4 sm:$0xff]   ;;  %v3451_v12 = vld [vmem:[#allocation5 + $0x3c4] ss:$120 sps:$4 sm:$0xff]   ;;  %v3455_v14 = vld [vmem:[#allocation5 + $0x3c0] ss:$120 sps:$4 sm:$0xff]  }
  0x2a   :  { %v3453_v13 = vld [vmem:[#allocation5 + $0x3cc] ss:$120 sps:$4 sm:$0xff]   ;;  %v3456_v15 = vld [vmem:[#allocation5 + $0x3c8] ss:$120 sps:$4 sm:$0xff]   ;;  %v3459_v17 = vld [vmem:[#allocation5 + $0x2dc] ss:$120 sps:$4 sm:$0xff]  }
  0x2b   :  { %2043 = vmatpush1.bf16.msra.mxu0 %v3443_v6  ;;  %v3457_v16 = vld [vmem:[#allocation5 + $0x2d4] ss:$120 sps:$4 sm:$0xff]   ;;  %v3461_v18 = vld [vmem:[#allocation5 + $0x2d0] ss:$120 sps:$4 sm:$0xff]   ;;  %v3463_v20 = vld [vmem:[#allocation5 + $0x1e4] ss:$120 sps:$4 sm:$0xff]  }
  0x2c   :  { %2084 = vmatpush1.bf16.msra.mxu1 %v3444_v7  ;;  %2044 = vmatprep.subr.bf16.mxu0 %v3445_v8  ;;  %v3462_v19 = vld [vmem:[#allocation5 + $0x2d8] ss:$120 sps:$4 sm:$0xff]   ;;  %v3465_v21 = vld [vmem:[#allocation5 + $0x1ec] ss:$120 sps:$4 sm:$0xff]   ;;  %v4094_v22 = vmov 1966171168  }
  0x2d   :  { %2085 = vmatprep.subr.bf16.mxu1 %v3447_v9  ;;  %v368_v23 = vunpack.c.l.s4 %v4094_v22  ;;  %v3467_v25 = vld [vmem:[#allocation5 + $0x1e0] ss:$120 sps:$4 sm:$0xff]   ;;  %v3469_v27 = vld [vmem:[#allocation5 + $0xf4] ss:$120 sps:$4 sm:$0xff]   ;;  %v4126_v30 = vshrl.u32 %v370_v24, 7  ;;  %vm2036_vm0 = vcmask 261120  }
  0x2e   :  { %v3468_v26 = vld [vmem:[#allocation5 + $0x1e8] ss:$120 sps:$4 sm:$0xff]   ;;  %v3471_v28 = vld [vmem:[#allocation5 + $0xfc] ss:$120 sps:$4 sm:$0xff]   ;;  %v3474_v32 = vld [vmem:[#allocation5 + $0xf8] ss:$120 sps:$4 sm:$0xff]  }
  0x2f   :  { %2045 = vmatpush1.bf16.msra.mxu0 %v3449_v10  ;;  %v369_v29 = vunpack.c.0.s8 %v368_v23  ;;  %v3473_v31 = vld [vmem:[#allocation5 + $0xf0] ss:$120 sps:$4 sm:$0xff]   ;;  %v3475_v33 = vld [vmem:[#allocation5 + $0x4] ss:$120 sps:$4 sm:$0xff]   ;;  %v3479_v37 = vld [vmem:[#allocation5] ss:$120 sps:$4 sm:$0xff]  }
  0x30   :  { %2086 = vmatpush1.bf16.msra.mxu1 %v3450_v11  ;;  %2046 = vmatprep.subr.bf16.mxu0 %v3451_v12  ;;  %v3477_v34 = vld [vmem:[#allocation5 + $0xc] ss:$120 sps:$4 sm:$0xff]   ;;  %v3080_v36 = vld.sshfl [vmem:[#allocation2] sm:$0x11 pattern:$0x75316420] }
  0x31   :  { %2087 = vmatprep.subr.bf16.mxu1 %v3453_v13  ;;  %v4129_v35 = vsub.s32 %v369_v29, %v4126_v30  ;;  %v3480_v38 = vld [vmem:[#allocation5 + $0x8] ss:$120 sps:$4 sm:$0xff]   ;;  %v366_v39 = vcombine.high %v3080_v36, %v3080_v36  ;;  %v3481_v40 = vld [vmem:[#allocation5 + $0x874] ss:$120 sps:$4 sm:$0xff]   ;;  %v3486_v44 = vld [vmem:[#allocation5 + $0x878] ss:$120 sps:$4 sm:$0xff]  }
  0x32   :  { %v3483_v41 = vld [vmem:[#allocation5 + $0x87c] ss:$120 sps:$4 sm:$0xff]   ;;  %v3485_v43 = vld [vmem:[#allocation5 + $0x870] ss:$120 sps:$4 sm:$0xff]   ;;  %v3489_v46 = vld [vmem:[#allocation5 + $0x78c] ss:$120 sps:$4 sm:$0xff]  }
  0x33   :  { %2047 = vmatpush1.bf16.msra.mxu0 %v3455_v14  ;;  %v4132_v42 = vrot.slane %v366_v39, %v4129_v35  ;;  %v3487_v45 = vld [vmem:[#allocation5 + $0x784] ss:$120 sps:$4 sm:$0xff]   ;;  %v3491_v47 = vld [vmem:[#allocation5 + $0x780] ss:$120 sps:$4 sm:$0xff]   ;;  %v4139_v51 = vrot.slane %v3080_v36, %v4129_v35  ;;  %v3501_v54 = vld [vmem:[#allocation5 + $0x5b4] ss:$120 sps:$4 sm:$0xff]  }
  0x34   :  { %2088 = vmatpush1.bf16.msra.mxu1 %v3456_v15  ;;  %2048 = vmatprep.subr.bf16.mxu0 %v3457_v16  ;;  %v3492_v48 = vld [vmem:[#allocation5 + $0x788] ss:$120 sps:$4 sm:$0xff]   ;;  %v3495_v49 = vld [vmem:[#allocation5 + $0x6a4] ss:$120 sps:$4 sm:$0xff]   ;;  %v3502_v57 = vld [vmem:[#allocation5 + $0x5b8] ss:$120 sps:$4 sm:$0xff]  }
  0x35   :  { %2089 = vmatprep.subr.bf16.mxu1 %v3459_v17  ;;  %3381 = vmatprep.mubr.msk.bf16.mxu0 %vm2036_vm0, %v4132_v42  ;;  %v3498_v50 = vld [vmem:[#allocation5 + $0x6ac] ss:$120 sps:$4 sm:$0xff]   ;;  %v3493_v52 = vld [vmem:[#allocation5 + $0x6a0] ss:$120 sps:$4 sm:$0xff]   ;;  %v3504_v55 = vld [vmem:[#allocation5 + $0x5bc] ss:$120 sps:$4 sm:$0xff]  }
  0x36   :  { %3382 = vmatprep.mubr.msk.bf16.mxu1 %vm2036_vm0, %v4132_v42  ;;  %v3496_v53 = vld [vmem:[#allocation5 + $0x6a8] ss:$120 sps:$4 sm:$0xff]   ;;  %v3507_v58 = vld [vmem:[#allocation5 + $0x4c4] ss:$120 sps:$4 sm:$0xff]   ;;  %v3513_v62 = vld [vmem:[#allocation5 + $0x3d4] ss:$120 sps:$4 sm:$0xff]  }
  0x37   :  { %2049 = vmatpush1.bf16.msra.mxu0 %v3461_v18  ;;  %v3499_v56 = vld [vmem:[#allocation5 + $0x5b0] ss:$120 sps:$4 sm:$0xff]   ;;  %v3510_v59 = vld [vmem:[#allocation5 + $0x4cc] ss:$120 sps:$4 sm:$0xff]   ;;  %v3505_v60 = vld [vmem:[#allocation5 + $0x4c0] ss:$120 sps:$4 sm:$0xff]  }
  0x38   :  { %2090 = vmatpush1.bf16.msra.mxu1 %v3462_v19  ;;  %2050 = vmatprep.subr.bf16.mxu0 %v3463_v20  ;;  %v3508_v61 = vld [vmem:[#allocation5 + $0x4c8] ss:$120 sps:$4 sm:$0xff]   ;;  %v3516_v63 = vld [vmem:[#allocation5 + $0x3dc] ss:$120 sps:$4 sm:$0xff]   ;;  %v3514_v1 = vld [vmem:[#allocation5 + $0x3d8] ss:$120 sps:$4 sm:$0xff]  }
  0x39   :  { %2091 = vmatprep.subr.bf16.mxu1 %v3465_v21  ;;  %v3511_v0 = vld [vmem:[#allocation5 + $0x3d0] ss:$120 sps:$4 sm:$0xff]   ;;  %v3519_v2 = vld [vmem:[#allocation5 + $0x2e4] ss:$120 sps:$4 sm:$0xff]   ;;  %v3517_v4 = vld [vmem:[#allocation5 + $0x2e0] ss:$120 sps:$4 sm:$0xff]  }
  0x3a   :  { %v3522_v3 = vld [vmem:[#allocation5 + $0x2ec] ss:$120 sps:$4 sm:$0xff]   ;;  %v3520_v5 = vld [vmem:[#allocation5 + $0x2e8] ss:$120 sps:$4 sm:$0xff]   ;;  %v3528_v7 = vld [vmem:[#allocation5 + $0x1fc] ss:$120 sps:$4 sm:$0xff]  }
  0x3b   :  { %2051 = vmatpush1.bf16.msra.mxu0 %v3467_v25  ;;  %v3525_v6 = vld [vmem:[#allocation5 + $0x1f4] ss:$120 sps:$4 sm:$0xff]   ;;  %v3523_v8 = vld [vmem:[#allocation5 + $0x1f0] ss:$120 sps:$4 sm:$0xff]   ;;  %v3531_v10 = vld [vmem:[#allocation5 + $0x104] ss:$120 sps:$4 sm:$0xff]  }
  0x3c   :  { %2092 = vmatpush1.bf16.msra.mxu1 %v3468_v26  ;;  %2052 = vmatprep.subr.bf16.mxu0 %v3469_v27  ;;  %v3526_v9 = vld [vmem:[#allocation5 + $0x1f8] ss:$120 sps:$4 sm:$0xff]   ;;  %v3534_v11 = vld [vmem:[#allocation5 + $0x10c] ss:$120 sps:$4 sm:$0xff]   ;;  %v3532_v13 = vld [vmem:[#allocation5 + $0x108] ss:$120 sps:$4 sm:$0xff]  }
  0x3d   :  { %2093 = vmatprep.subr.bf16.mxu1 %v3471_v28  ;;  %v3529_v12 = vld [vmem:[#allocation5 + $0x100] ss:$120 sps:$4 sm:$0xff]   ;;  %v3537_v14 = vld [vmem:[#allocation5 + $0x14] ss:$120 sps:$4 sm:$0xff]   ;;  %v3535_v16 = vld [vmem:[#allocation5 + $0x10] ss:$120 sps:$4 sm:$0xff]  }
  0x3e   :  { %v3540_v15 = vld [vmem:[#allocation5 + $0x1c] ss:$120 sps:$4 sm:$0xff]   ;;  %v3538_v17 = vld [vmem:[#allocation5 + $0x18] ss:$120 sps:$4 sm:$0xff]   ;;  %v3546_v19 = vld [vmem:[#allocation5 + $0x88c] ss:$120 sps:$4 sm:$0xff]  }
  0x3f   :  { %2053 = vmatpush1.bf16.msra.mxu0 %v3473_v31  ;;  %v3543_v18 = vld [vmem:[#allocation5 + $0x884] ss:$120 sps:$4 sm:$0xff]   ;;  %v3541_v20 = vld [vmem:[#allocation5 + $0x880] ss:$120 sps:$4 sm:$0xff]   ;;  %v3549_v22 = vld [vmem:[#allocation5 + $0x794] ss:$120 sps:$4 sm:$0xff]  }
  0x40   :  { %2094 = vmatpush1.bf16.msra.mxu1 %v3474_v32  ;;  %2054 = vmatprep.subr.bf16.mxu0 %v3475_v33  ;;  %v3544_v21 = vld [vmem:[#allocation5 + $0x888] ss:$120 sps:$4 sm:$0xff]   ;;  %v3552_v23 = vld [vmem:[#allocation5 + $0x79c] ss:$120 sps:$4 sm:$0xff]   ;;  %v3550_v26 = vld [vmem:[#allocation5 + $0x798] ss:$120 sps:$4 sm:$0xff]  }
  0x41   :  { %2095 = vmatprep.subr.bf16.mxu1 %v3477_v34  ;;  %v3547_v25 = vld [vmem:[#allocation5 + $0x790] ss:$120 sps:$4 sm:$0xff]   ;;  %v3555_v27 = vld [vmem:[#allocation5 + $0x6b4] ss:$120 sps:$4 sm:$0xff]   ;;  %v3561_v32 = vld [vmem:[#allocation5 + $0x5c4] ss:$120 sps:$4 sm:$0xff]  }
  0x42   :  { %v3558_v28 = vld [vmem:[#allocation5 + $0x6bc] ss:$120 sps:$4 sm:$0xff]   ;;  %v3553_v29 = vld [vmem:[#allocation5 + $0x6b0] ss:$120 sps:$4 sm:$0xff]   ;;  %v3564_v33 = vld [vmem:[#allocation5 + $0x5cc] ss:$120 sps:$4 sm:$0xff]  }
  0x43   :  { %2055 = vmatpush1.bf16.msra.mxu0 %v3479_v37  ;;  %v3556_v31 = vld [vmem:[#allocation5 + $0x6b8] ss:$120 sps:$4 sm:$0xff]   ;;  %v3562_v36 = vld [vmem:[#allocation5 + $0x5c8] ss:$120 sps:$4 sm:$0xff]   ;;  %v3567_v37 = vld [vmem:[#allocation5 + $0x4d4] ss:$120 sps:$4 sm:$0xff]  }
  0x44   :  { %2096 = vmatpush1.bf16.msra.mxu1 %v3480_v38  ;;  %2068 = vmatprep.subr.bf16.mxu0 %v3481_v40  ;;  %v3559_v34 = vld [vmem:[#allocation5 + $0x5c0] ss:$120 sps:$4 sm:$0xff]   ;;  %v3570_v38 = vld [vmem:[#allocation5 + $0x4dc] ss:$120 sps:$4 sm:$0xff]   ;;  %v3565_v39 = vld [vmem:[#allocation5 + $0x4d0] ss:$120 sps:$4 sm:$0xff]  }
  0x45   :  { %2109 = vmatprep.subr.bf16.mxu1 %v3483_v41  ;;  %v3568_v40 = vld [vmem:[#allocation5 + $0x4d8] ss:$120 sps:$4 sm:$0xff]   ;;  %v3573_v41 = vld [vmem:[#allocation5 + $0x3e4] ss:$120 sps:$4 sm:$0xff]   ;;  %s4095_s0 = smov [#allocation8]   ;;  %vm3061_vm1 = vcmp.lt.s32.totalorder %v370_v24, 768 }
  0x46   :  { %s3070_s2 = sshll.u32 %s4095_s0, 4  ;;  %s3071_s2 = int_to_ptr.vmem [resolvable:$true] %s3070_s2 }
  0x47   :  { %2069 = vmatpush2.bf16.msra.mxu0 %v3485_v43  ;;  %v3576_v43 = vld [vmem:[#allocation5 + $0x3ec] ss:$120 sps:$4 sm:$0xff]   ;;  %s4063_s28 = scalar_lea.vmem %s3071_s2, 480  ;;  %p4068_p2 = scmp.lt.s32.totalorder %s3071_s2, %s3071_s2 }
  0x48   :  { %2110 = vmatpush2.bf16.msra.mxu1 %v3486_v44  ;;  %2070 = vmatprep.subr.bf16.mxu0 %v3487_v45  ;;  %v3571_v44 = vld [vmem:[#allocation5 + $0x3e0] ss:$120 sps:$4 sm:$0xff]   ;;  %p4064_p1 = scmp.ne.s32.totalorder %s3071_s2, %s4063_s28  ;;  %p4069_p3 = scmp.lt.s32.totalorder %s4063_s28, %s4063_s28 }
  0x49   :  { %2111 = vmatprep.subr.bf16.mxu1 %v3489_v46  ;;  %v3574_v45 = vld [vmem:[#allocation5 + $0x3e8] ss:$120 sps:$4 sm:$0xff]   ;;  %v3579_v46 = vld [vmem:[#allocation5 + $0x2f4] ss:$120 sps:$4 sm:$0xff]  }
  0x4a   :  { %p4070_p4 = por %p4069_p3, %p4068_p2 }
  0x4b   :  { %2071 = vmatpush2.bf16.msra.mxu0 %v3491_v47  ;;  %v3582_v47 = vld [vmem:[#allocation5 + $0x2fc] ss:$120 sps:$4 sm:$0xff]  }
  0x4c   :  { %2112 = vmatpush2.bf16.msra.mxu1 %v3492_v48  ;;  %2122 = vmatprep.subr.bf16.mxu0 %v3495_v49  ;;  %v3577_v48 = vld [vmem:[#allocation5 + $0x2f0] ss:$120 sps:$4 sm:$0xff]   ;;  %p4071_p5 = pnand %p4070_p4, %p4064_p1 }
  0x4d   :  { %2163 = vmatprep.subr.bf16.mxu1 %v3498_v50  ;;  %v3580_v49 = vld [vmem:[#allocation5 + $0x2f8] ss:$120 sps:$4 sm:$0xff]   ;;  %v3585_v50 = vld [vmem:[#allocation5 + $0x204] ss:$120 sps:$4 sm:$0xff]  }
  0x4e   :  { %2073 = vmatmul.mubr.bf16.vlgmr.msra.gmra.mxu0 %v4139_v51 }
  0x4f   :  { %2114 = vmatmul.mubr.bf16.vlgmr.msra.gmra.mxu1 %v4139_v51  ;;  %2123 = vmatpush1.bf16.msra.mxu0 %v3493_v52  ;;  %v3588_v52 = vld [vmem:[#allocation5 + $0x20c] ss:$120 sps:$4 sm:$0xff]  }
  0x50   :  { %2164 = vmatpush1.bf16.msra.mxu1 %v3496_v53  ;;  %2124 = vmatprep.subr.bf16.mxu0 %v3501_v54  ;;  %v3583_v53 = vld [vmem:[#allocation5 + $0x200] ss:$120 sps:$4 sm:$0xff]  }
  0x51   :  { %2165 = vmatprep.subr.bf16.mxu1 %v3504_v55  ;;  %3383 = vmatprep.mubr.msk.bf16.mxu0 %vm2036_vm0, %v4132_v42  ;;  %v3586_v54 = vld [vmem:[#allocation5 + $0x208] ss:$120 sps:$4 sm:$0xff]   ;;  %v3591_v55 = vld [vmem:[#allocation5 + $0x114] ss:$120 sps:$4 sm:$0xff]  }
  0x52   :  { %3384 = vmatprep.mubr.msk.bf16.mxu1 %vm2036_vm0, %v4132_v42 }
  0x53   :  { %2125 = vmatpush1.bf16.msra.mxu0 %v3499_v56  ;;  %v3594_v56 = vld [vmem:[#allocation5 + $0x11c] ss:$120 sps:$4 sm:$0xff]  }
  0x54   :  { %2166 = vmatpush1.bf16.msra.mxu1 %v3502_v57  ;;  %2126 = vmatprep.subr.bf16.mxu0 %v3507_v58  ;;  %v3589_v57 = vld [vmem:[#allocation5 + $0x110] ss:$120 sps:$4 sm:$0xff]  }
  0x55   :  { %2167 = vmatprep.subr.bf16.mxu1 %v3510_v59  ;;  %v3592_v58 = vld [vmem:[#allocation5 + $0x118] ss:$120 sps:$4 sm:$0xff]   ;;  %v3597_v59 = vld [vmem:[#allocation5 + $0x24] ss:$120 sps:$4 sm:$0xff]  }
  0x57   :  { %2127 = vmatpush1.bf16.msra.mxu0 %v3505_v60  ;;  %v3600_v60 = vld [vmem:[#allocation5 + $0x2c] ss:$120 sps:$4 sm:$0xff]  }
  0x58   :  { %2168 = vmatpush1.bf16.msra.mxu1 %v3508_v61  ;;  %2128 = vmatprep.subr.bf16.mxu0 %v3513_v62  ;;  %v3595_v61 = vld [vmem:[#allocation5 + $0x20] ss:$120 sps:$4 sm:$0xff]  }
  0x59   :  { %2169 = vmatprep.subr.bf16.mxu1 %v3516_v63  ;;  %v3598_v62 = vld [vmem:[#allocation5 + $0x28] ss:$120 sps:$4 sm:$0xff]   ;;  %v3603_v63 = vld [vmem:[#allocation5 + $0x894] ss:$120 sps:$4 sm:$0xff]  }
  0x5b   :  { %2129 = vmatpush1.bf16.msra.mxu0 %v3511_v0  ;;  %v3606_v0 = vld [vmem:[#allocation5 + $0x89c] ss:$120 sps:$4 sm:$0xff]  }
  0x5c   :  { %2170 = vmatpush1.bf16.msra.mxu1 %v3514_v1  ;;  %2130 = vmatprep.subr.bf16.mxu0 %v3519_v2  ;;  %v3601_v1 = vld [vmem:[#allocation5 + $0x890] ss:$120 sps:$4 sm:$0xff]  }
  0x5d   :  { %2171 = vmatprep.subr.bf16.mxu1 %v3522_v3  ;;  %v3604_v2 = vld [vmem:[#allocation5 + $0x898] ss:$120 sps:$4 sm:$0xff]   ;;  %v3609_v3 = vld [vmem:[#allocation5 + $0x7a4] ss:$120 sps:$4 sm:$0xff]  }
  0x5f   :  { %2131 = vmatpush1.bf16.msra.mxu0 %v3517_v4  ;;  %v3612_v4 = vld [vmem:[#allocation5 + $0x7ac] ss:$120 sps:$4 sm:$0xff]  }
  0x60   :  { %2172 = vmatpush1.bf16.msra.mxu1 %v3520_v5  ;;  %2132 = vmatprep.subr.bf16.mxu0 %v3525_v6  ;;  %v3607_v5 = vld [vmem:[#allocation5 + $0x7a0] ss:$120 sps:$4 sm:$0xff]  }
  0x61   :  { %2173 = vmatprep.subr.bf16.mxu1 %v3528_v7  ;;  %v3610_v6 = vld [vmem:[#allocation5 + $0x7a8] ss:$120 sps:$4 sm:$0xff]   ;;  %v3615_v7 = vld [vmem:[#allocation5 + $0x6c4] ss:$120 sps:$4 sm:$0xff]  }
  0x63   :  { %2133 = vmatpush1.bf16.msra.mxu0 %v3523_v8  ;;  %v3618_v8 = vld [vmem:[#allocation5 + $0x6cc] ss:$120 sps:$4 sm:$0xff]  }
  0x64   :  { %2174 = vmatpush1.bf16.msra.mxu1 %v3526_v9  ;;  %2134 = vmatprep.subr.bf16.mxu0 %v3531_v10  ;;  %v3613_v9 = vld [vmem:[#allocation5 + $0x6c0] ss:$120 sps:$4 sm:$0xff]  }
  0x65   :  { %2175 = vmatprep.subr.bf16.mxu1 %v3534_v11  ;;  %v3616_v10 = vld [vmem:[#allocation5 + $0x6c8] ss:$120 sps:$4 sm:$0xff]   ;;  %v3621_v11 = vld [vmem:[#allocation5 + $0x5d4] ss:$120 sps:$4 sm:$0xff]  }
  0x67   :  { %2135 = vmatpush1.bf16.msra.mxu0 %v3529_v12  ;;  %v3624_v12 = vld [vmem:[#allocation5 + $0x5dc] ss:$120 sps:$4 sm:$0xff]  }
  0x68   :  { %2176 = vmatpush1.bf16.msra.mxu1 %v3532_v13  ;;  %2136 = vmatprep.subr.bf16.mxu0 %v3537_v14  ;;  %v3619_v13 = vld [vmem:[#allocation5 + $0x5d0] ss:$120 sps:$4 sm:$0xff]  }
  0x69   :  { %2177 = vmatprep.subr.bf16.mxu1 %v3540_v15  ;;  %v3622_v14 = vld [vmem:[#allocation5 + $0x5d8] ss:$120 sps:$4 sm:$0xff]   ;;  %v3627_v15 = vld [vmem:[#allocation5 + $0x4e4] ss:$120 sps:$4 sm:$0xff]  }
  0x6b   :  { %2137 = vmatpush1.bf16.msra.mxu0 %v3535_v16  ;;  %v3630_v16 = vld [vmem:[#allocation5 + $0x4ec] ss:$120 sps:$4 sm:$0xff]  }
  0x6c   :  { %2178 = vmatpush1.bf16.msra.mxu1 %v3538_v17  ;;  %2150 = vmatprep.subr.bf16.mxu0 %v3543_v18  ;;  %v3625_v17 = vld [vmem:[#allocation5 + $0x4e0] ss:$120 sps:$4 sm:$0xff]  }
  0x6d   :  { %2191 = vmatprep.subr.bf16.mxu1 %v3546_v19  ;;  %v3628_v18 = vld [vmem:[#allocation5 + $0x4e8] ss:$120 sps:$4 sm:$0xff]   ;;  %v3633_v19 = vld [vmem:[#allocation5 + $0x3f4] ss:$120 sps:$4 sm:$0xff]  }
  0x6f   :  { %2151 = vmatpush2.bf16.msra.mxu0 %v3541_v20  ;;  %v3636_v20 = vld [vmem:[#allocation5 + $0x3fc] ss:$120 sps:$4 sm:$0xff]  }
  0x70   :  { %2192 = vmatpush2.bf16.msra.mxu1 %v3544_v21  ;;  %2152 = vmatprep.subr.bf16.mxu0 %v3549_v22  ;;  %v3631_v21 = vld [vmem:[#allocation5 + $0x3f0] ss:$120 sps:$4 sm:$0xff]  }
  0x71   :  { %2193 = vmatprep.subr.bf16.mxu1 %v3552_v23  ;;  %v3634_v22 = vld [vmem:[#allocation5 + $0x3f8] ss:$120 sps:$4 sm:$0xff]   ;;  %v3639_v23 = vld [vmem:[#allocation5 + $0x304] ss:$120 sps:$4 sm:$0xff]  }
  0x73   :  { %2153 = vmatpush2.bf16.msra.mxu0 %v3547_v25  ;;  %v3642_v25 = vld [vmem:[#allocation5 + $0x30c] ss:$120 sps:$4 sm:$0xff]  }
  0x74   :  { %2194 = vmatpush2.bf16.msra.mxu1 %v3550_v26  ;;  %2204 = vmatprep.subr.bf16.mxu0 %v3555_v27  ;;  %v3637_v26 = vld [vmem:[#allocation5 + $0x300] ss:$120 sps:$4 sm:$0xff]  }
  0x75   :  { %2245 = vmatprep.subr.bf16.mxu1 %v3558_v28  ;;  %v3640_v27 = vld [vmem:[#allocation5 + $0x308] ss:$120 sps:$4 sm:$0xff]   ;;  %v3645_v28 = vld [vmem:[#allocation5 + $0x214] ss:$120 sps:$4 sm:$0xff]  }
  0x76   :  { %2155 = vmatmul.mubr.bf16.vlgmr.msra.gmra.mxu0 %v4139_v51 }
  0x77   :  { %2196 = vmatmul.mubr.bf16.vlgmr.msra.gmra.mxu1 %v4139_v51  ;;  %2205 = vmatpush1.bf16.msra.mxu0 %v3553_v29  ;;  %v3648_v29 = vld [vmem:[#allocation5 + $0x21c] ss:$120 sps:$4 sm:$0xff]  }
  0x78   :  { %2246 = vmatpush1.bf16.msra.mxu1 %v3556_v31  ;;  %2206 = vmatprep.subr.bf16.mxu0 %v3561_v32  ;;  %v3643_v31 = vld [vmem:[#allocation5 + $0x210] ss:$120 sps:$4 sm:$0xff]  }
  0x79   :  { %2247 = vmatprep.subr.bf16.mxu1 %v3564_v33  ;;  %3385 = vmatprep.mubr.msk.bf16.mxu0 %vm2036_vm0, %v4132_v42  ;;  %v3646_v32 = vld [vmem:[#allocation5 + $0x218] ss:$120 sps:$4 sm:$0xff]   ;;  %v3651_v33 = vld [vmem:[#allocation5 + $0x124] ss:$120 sps:$4 sm:$0xff]  }
  0x7a   :  { %3386 = vmatprep.mubr.msk.bf16.mxu1 %vm2036_vm0, %v4132_v42 }
  0x7b   :  { %2207 = vmatpush1.bf16.msra.mxu0 %v3559_v34  ;;  %v3654_v34 = vld [vmem:[#allocation5 + $0x12c] ss:$120 sps:$4 sm:$0xff]  }
  0x7c   :  { %2248 = vmatpush1.bf16.msra.mxu1 %v3562_v36  ;;  %2208 = vmatprep.subr.bf16.mxu0 %v3567_v37  ;;  %v3649_v36 = vld [vmem:[#allocation5 + $0x120] ss:$120 sps:$4 sm:$0xff]  }
  0x7d   :  { %2249 = vmatprep.subr.bf16.mxu1 %v3570_v38  ;;  %v3652_v37 = vld [vmem:[#allocation5 + $0x128] ss:$120 sps:$4 sm:$0xff]   ;;  %v3657_v38 = vld [vmem:[#allocation5 + $0x34] ss:$120 sps:$4 sm:$0xff]  }
  0x7f   :  { %2209 = vmatpush1.bf16.msra.mxu0 %v3565_v39  ;;  %v3660_v39 = vld [vmem:[#allocation5 + $0x3c] ss:$120 sps:$4 sm:$0xff]  }
  0x80   :  { %2250 = vmatpush1.bf16.msra.mxu1 %v3568_v40  ;;  %2210 = vmatprep.subr.bf16.mxu0 %v3573_v41  ;;  %v3655_v40 = vld [vmem:[#allocation5 + $0x30] ss:$120 sps:$4 sm:$0xff]  }
  0x81   :  { %2251 = vmatprep.subr.bf16.mxu1 %v3576_v43  ;;  %v3658_v41 = vld [vmem:[#allocation5 + $0x38] ss:$120 sps:$4 sm:$0xff]   ;;  %v3663_v43 = vld [vmem:[#allocation5 + $0x8a4] ss:$120 sps:$4 sm:$0xff]  }
  0x83   :  { %2211 = vmatpush1.bf16.msra.mxu0 %v3571_v44  ;;  %v3666_v44 = vld [vmem:[#allocation5 + $0x8ac] ss:$120 sps:$4 sm:$0xff]  }
  0x84   :  { %2252 = vmatpush1.bf16.msra.mxu1 %v3574_v45  ;;  %2212 = vmatprep.subr.bf16.mxu0 %v3579_v46  ;;  %v3661_v45 = vld [vmem:[#allocation5 + $0x8a0] ss:$120 sps:$4 sm:$0xff]  }
  0x85   :  { %2253 = vmatprep.subr.bf16.mxu1 %v3582_v47  ;;  %v3664_v46 = vld [vmem:[#allocation5 + $0x8a8] ss:$120 sps:$4 sm:$0xff]   ;;  %v3669_v47 = vld [vmem:[#allocation5 + $0x7b4] ss:$120 sps:$4 sm:$0xff]  }
  0x87   :  { %2213 = vmatpush1.bf16.msra.mxu0 %v3577_v48  ;;  %v3672_v48 = vld [vmem:[#allocation5 + $0x7bc] ss:$120 sps:$4 sm:$0xff]  }
  0x88   :  { %2254 = vmatpush1.bf16.msra.mxu1 %v3580_v49  ;;  %2214 = vmatprep.subr.bf16.mxu0 %v3585_v50  ;;  %v3667_v49 = vld [vmem:[#allocation5 + $0x7b0] ss:$120 sps:$4 sm:$0xff]  }
  0x89   :  { %2255 = vmatprep.subr.bf16.mxu1 %v3588_v52  ;;  %v3670_v50 = vld [vmem:[#allocation5 + $0x7b8] ss:$120 sps:$4 sm:$0xff]   ;;  %v3675_v52 = vld [vmem:[#allocation5 + $0x6d4] ss:$120 sps:$4 sm:$0xff]  }
  0x8b   :  { %2215 = vmatpush1.bf16.msra.mxu0 %v3583_v53  ;;  %v3678_v53 = vld [vmem:[#allocation5 + $0x6dc] ss:$120 sps:$4 sm:$0xff]  }
  0x8c   :  { %2256 = vmatpush1.bf16.msra.mxu1 %v3586_v54  ;;  %2216 = vmatprep.subr.bf16.mxu0 %v3591_v55  ;;  %v3673_v54 = vld [vmem:[#allocation5 + $0x6d0] ss:$120 sps:$4 sm:$0xff]  }
  0x8d   :  { %2257 = vmatprep.subr.bf16.mxu1 %v3594_v56  ;;  %v3676_v55 = vld [vmem:[#allocation5 + $0x6d8] ss:$120 sps:$4 sm:$0xff]   ;;  %v3681_v56 = vld [vmem:[#allocation5 + $0x5e4] ss:$120 sps:$4 sm:$0xff]  }
  0x8f   :  { %2217 = vmatpush1.bf16.msra.mxu0 %v3589_v57  ;;  %v3684_v57 = vld [vmem:[#allocation5 + $0x5ec] ss:$120 sps:$4 sm:$0xff]  }
  0x90   :  { %2258 = vmatpush1.bf16.msra.mxu1 %v3592_v58  ;;  %2218 = vmatprep.subr.bf16.mxu0 %v3597_v59  ;;  %v3679_v58 = vld [vmem:[#allocation5 + $0x5e0] ss:$120 sps:$4 sm:$0xff]  }
  0x91   :  { %2259 = vmatprep.subr.bf16.mxu1 %v3600_v60  ;;  %v3682_v59 = vld [vmem:[#allocation5 + $0x5e8] ss:$120 sps:$4 sm:$0xff]   ;;  %v3687_v60 = vld [vmem:[#allocation5 + $0x4f4] ss:$120 sps:$4 sm:$0xff]  }
  0x93   :  { %2219 = vmatpush1.bf16.msra.mxu0 %v3595_v61  ;;  %v3690_v61 = vld [vmem:[#allocation5 + $0x4fc] ss:$120 sps:$4 sm:$0xff]  }
  0x94   :  { %2260 = vmatpush1.bf16.msra.mxu1 %v3598_v62  ;;  %2232 = vmatprep.subr.bf16.mxu0 %v3603_v63  ;;  %v3685_v62 = vld [vmem:[#allocation5 + $0x4f0] ss:$120 sps:$4 sm:$0xff]  }
  0x95   :  { %2273 = vmatprep.subr.bf16.mxu1 %v3606_v0  ;;  %v3688_v63 = vld [vmem:[#allocation5 + $0x4f8] ss:$120 sps:$4 sm:$0xff]   ;;  %v3693_v0 = vld [vmem:[#allocation5 + $0x404] ss:$120 sps:$4 sm:$0xff]  }
  0x97   :  { %2233 = vmatpush2.bf16.msra.mxu0 %v3601_v1  ;;  %v3696_v1 = vld [vmem:[#allocation5 + $0x40c] ss:$120 sps:$4 sm:$0xff]  }
  0x98   :  { %2274 = vmatpush2.bf16.msra.mxu1 %v3604_v2  ;;  %2234 = vmatprep.subr.bf16.mxu0 %v3609_v3  ;;  %v3691_v2 = vld [vmem:[#allocation5 + $0x400] ss:$120 sps:$4 sm:$0xff]  }
  0x99   :  { %2275 = vmatprep.subr.bf16.mxu1 %v3612_v4  ;;  %v3694_v3 = vld [vmem:[#allocation5 + $0x408] ss:$120 sps:$4 sm:$0xff]   ;;  %v3699_v4 = vld [vmem:[#allocation5 + $0x314] ss:$120 sps:$4 sm:$0xff]  }
  0x9b   :  { %2235 = vmatpush2.bf16.msra.mxu0 %v3607_v5  ;;  %v3702_v5 = vld [vmem:[#allocation5 + $0x31c] ss:$120 sps:$4 sm:$0xff]  }
  0x9c   :  { %2276 = vmatpush2.bf16.msra.mxu1 %v3610_v6  ;;  %2286 = vmatprep.subr.bf16.mxu0 %v3615_v7  ;;  %v3697_v6 = vld [vmem:[#allocation5 + $0x310] ss:$120 sps:$4 sm:$0xff]  }
  0x9d   :  { %2327 = vmatprep.subr.bf16.mxu1 %v3618_v8  ;;  %v3700_v7 = vld [vmem:[#allocation5 + $0x318] ss:$120 sps:$4 sm:$0xff]   ;;  %v3705_v8 = vld [vmem:[#allocation5 + $0x224] ss:$120 sps:$4 sm:$0xff]  }
  0x9e   :  { %2237 = vmatmul.mubr.bf16.vlgmr.msra.gmra.mxu0 %v4139_v51 }
  0x9f   :  { %2278 = vmatmul.mubr.bf16.vlgmr.msra.gmra.mxu1 %v4139_v51  ;;  %2287 = vmatpush1.bf16.msra.mxu0 %v3613_v9  ;;  %v3708_v9 = vld [vmem:[#allocation5 + $0x22c] ss:$120 sps:$4 sm:$0xff]  }
  0xa0   :  { %2328 = vmatpush1.bf16.msra.mxu1 %v3616_v10  ;;  %2288 = vmatprep.subr.bf16.mxu0 %v3621_v11  ;;  %v3703_v10 = vld [vmem:[#allocation5 + $0x220] ss:$120 sps:$4 sm:$0xff]  }
  0xa1   :  { %2329 = vmatprep.subr.bf16.mxu1 %v3624_v12  ;;  %3387 = vmatprep.mubr.msk.bf16.mxu0 %vm2036_vm0, %v4132_v42  ;;  %v3706_v11 = vld [vmem:[#allocation5 + $0x228] ss:$120 sps:$4 sm:$0xff]   ;;  %v3711_v12 = vld [vmem:[#allocation5 + $0x134] ss:$120 sps:$4 sm:$0xff]  }
  0xa2   :  { %3388 = vmatprep.mubr.msk.bf16.mxu1 %vm2036_vm0, %v4132_v42 }
  0xa3   :  { %2289 = vmatpush1.bf16.msra.mxu0 %v3619_v13  ;;  %v3714_v13 = vld [vmem:[#allocation5 + $0x13c] ss:$120 sps:$4 sm:$0xff]  }
  0xa4   :  { %2330 = vmatpush1.bf16.msra.mxu1 %v3622_v14  ;;  %2290 = vmatprep.subr.bf16.mxu0 %v3627_v15  ;;  %v3709_v14 = vld [vmem:[#allocation5 + $0x130] ss:$120 sps:$4 sm:$0xff]  }
  0xa5   :  { %2331 = vmatprep.subr.bf16.mxu1 %v3630_v16  ;;  %v3712_v15 = vld [vmem:[#allocation5 + $0x138] ss:$120 sps:$4 sm:$0xff]   ;;  %v3717_v16 = vld [vmem:[#allocation5 + $0x44] ss:$120 sps:$4 sm:$0xff]  }
  0xa7   :  { %2291 = vmatpush1.bf16.msra.mxu0 %v3625_v17  ;;  %v3720_v17 = vld [vmem:[#allocation5 + $0x4c] ss:$120 sps:$4 sm:$0xff]  }
  0xa8   :  { %2332 = vmatpush1.bf16.msra.mxu1 %v3628_v18  ;;  %2292 = vmatprep.subr.bf16.mxu0 %v3633_v19  ;;  %v3715_v18 = vld [vmem:[#allocation5 + $0x40] ss:$120 sps:$4 sm:$0xff]  }
  0xa9   :  { %2333 = vmatprep.subr.bf16.mxu1 %v3636_v20  ;;  %v3718_v19 = vld [vmem:[#allocation5 + $0x48] ss:$120 sps:$4 sm:$0xff]   ;;  %v3723_v20 = vld [vmem:[#allocation5 + $0x8b4] ss:$120 sps:$4 sm:$0xff]  }
  0xab   :  { %2293 = vmatpush1.bf16.msra.mxu0 %v3631_v21  ;;  %v3726_v21 = vld [vmem:[#allocation5 + $0x8bc] ss:$120 sps:$4 sm:$0xff]  }
  0xac   :  { %2334 = vmatpush1.bf16.msra.mxu1 %v3634_v22  ;;  %2294 = vmatprep.subr.bf16.mxu0 %v3639_v23  ;;  %v3721_v22 = vld [vmem:[#allocation5 + $0x8b0] ss:$120 sps:$4 sm:$0xff]  }
  0xad   :  { %2335 = vmatprep.subr.bf16.mxu1 %v3642_v25  ;;  %v3724_v23 = vld [vmem:[#allocation5 + $0x8b8] ss:$120 sps:$4 sm:$0xff]   ;;  %v3729_v25 = vld [vmem:[#allocation5 + $0x7c4] ss:$120 sps:$4 sm:$0xff]  }
  0xaf   :  { %2295 = vmatpush1.bf16.msra.mxu0 %v3637_v26  ;;  %v3732_v26 = vld [vmem:[#allocation5 + $0x7cc] ss:$120 sps:$4 sm:$0xff]  }
  0xb0   :  { %2336 = vmatpush1.bf16.msra.mxu1 %v3640_v27  ;;  %2296 = vmatprep.subr.bf16.mxu0 %v3645_v28  ;;  %v3727_v27 = vld [vmem:[#allocation5 + $0x7c0] ss:$120 sps:$4 sm:$0xff]  }
  0xb1   :  { %2337 = vmatprep.subr.bf16.mxu1 %v3648_v29  ;;  %v3730_v28 = vld [vmem:[#allocation5 + $0x7c8] ss:$120 sps:$4 sm:$0xff]   ;;  %v3735_v29 = vld [vmem:[#allocation5 + $0x6e4] ss:$120 sps:$4 sm:$0xff]  }
  0xb3   :  { %2297 = vmatpush1.bf16.msra.mxu0 %v3643_v31  ;;  %v3738_v31 = vld [vmem:[#allocation5 + $0x6ec] ss:$120 sps:$4 sm:$0xff]  }
  0xb4   :  { %2338 = vmatpush1.bf16.msra.mxu1 %v3646_v32  ;;  %2298 = vmatprep.subr.bf16.mxu0 %v3651_v33  ;;  %v3733_v32 = vld [vmem:[#allocation5 + $0x6e0] ss:$120 sps:$4 sm:$0xff]  }
  0xb5   :  { %2339 = vmatprep.subr.bf16.mxu1 %v3654_v34  ;;  %v3736_v33 = vld [vmem:[#allocation5 + $0x6e8] ss:$120 sps:$4 sm:$0xff]   ;;  %v3741_v34 = vld [vmem:[#allocation5 + $0x5f4] ss:$120 sps:$4 sm:$0xff]  }
  0xb7   :  { %2299 = vmatpush1.bf16.msra.mxu0 %v3649_v36  ;;  %v3744_v36 = vld [vmem:[#allocation5 + $0x5fc] ss:$120 sps:$4 sm:$0xff]  }
  0xb8   :  { %2340 = vmatpush1.bf16.msra.mxu1 %v3652_v37  ;;  %2300 = vmatprep.subr.bf16.mxu0 %v3657_v38  ;;  %v3739_v37 = vld [vmem:[#allocation5 + $0x5f0] ss:$120 sps:$4 sm:$0xff]  }
  0xb9   :  { %2341 = vmatprep.subr.bf16.mxu1 %v3660_v39  ;;  %v3742_v38 = vld [vmem:[#allocation5 + $0x5f8] ss:$120 sps:$4 sm:$0xff]   ;;  %v3747_v39 = vld [vmem:[#allocation5 + $0x504] ss:$120 sps:$4 sm:$0xff]  }
  0xbb   :  { %2301 = vmatpush1.bf16.msra.mxu0 %v3655_v40  ;;  %v3750_v40 = vld [vmem:[#allocation5 + $0x50c] ss:$120 sps:$4 sm:$0xff]  }
  0xbc   :  { %2342 = vmatpush1.bf16.msra.mxu1 %v3658_v41  ;;  %2314 = vmatprep.subr.bf16.mxu0 %v3663_v43  ;;  %v3745_v41 = vld [vmem:[#allocation5 + $0x500] ss:$120 sps:$4 sm:$0xff]  }
  0xbd   :  { %2355 = vmatprep.subr.bf16.mxu1 %v3666_v44  ;;  %v3748_v43 = vld [vmem:[#allocation5 + $0x508] ss:$120 sps:$4 sm:$0xff]   ;;  %v3753_v44 = vld [vmem:[#allocation5 + $0x414] ss:$120 sps:$4 sm:$0xff]  }
  0xbf   :  { %2315 = vmatpush2.bf16.msra.mxu0 %v3661_v45  ;;  %v3756_v45 = vld [vmem:[#allocation5 + $0x41c] ss:$120 sps:$4 sm:$0xff]  }
  0xc0   :  { %2356 = vmatpush2.bf16.msra.mxu1 %v3664_v46  ;;  %2316 = vmatprep.subr.bf16.mxu0 %v3669_v47  ;;  %v3751_v46 = vld [vmem:[#allocation5 + $0x410] ss:$120 sps:$4 sm:$0xff]  }
  0xc1   :  { %2357 = vmatprep.subr.bf16.mxu1 %v3672_v48  ;;  %v3754_v47 = vld [vmem:[#allocation5 + $0x418] ss:$120 sps:$4 sm:$0xff]   ;;  %v3759_v48 = vld [vmem:[#allocation5 + $0x324] ss:$120 sps:$4 sm:$0xff]  }
  0xc3   :  { %2317 = vmatpush2.bf16.msra.mxu0 %v3667_v49  ;;  %v3762_v49 = vld [vmem:[#allocation5 + $0x32c] ss:$120 sps:$4 sm:$0xff]  }
  0xc4   :  { %2358 = vmatpush2.bf16.msra.mxu1 %v3670_v50  ;;  %2368 = vmatprep.subr.bf16.mxu0 %v3675_v52  ;;  %v3757_v50 = vld [vmem:[#allocation5 + $0x320] ss:$120 sps:$4 sm:$0xff]  }
  0xc5   :  { %2409 = vmatprep.subr.bf16.mxu1 %v3678_v53  ;;  %v3760_v52 = vld [vmem:[#allocation5 + $0x328] ss:$120 sps:$4 sm:$0xff]   ;;  %v3765_v53 = vld [vmem:[#allocation5 + $0x234] ss:$120 sps:$4 sm:$0xff]  }
  0xc6   :  { %2319 = vmatmul.mubr.bf16.vlgmr.msra.gmra.mxu0 %v4139_v51 }
  0xc7   :  { %2360 = vmatmul.mubr.bf16.vlgmr.msra.gmra.mxu1 %v4139_v51  ;;  %2369 = vmatpush1.bf16.msra.mxu0 %v3673_v54  ;;  %v3768_v54 = vld [vmem:[#allocation5 + $0x23c] ss:$120 sps:$4 sm:$0xff]  }
  0xc8   :  { %2410 = vmatpush1.bf16.msra.mxu1 %v3676_v55  ;;  %2370 = vmatprep.subr.bf16.mxu0 %v3681_v56  ;;  %v3763_v55 = vld [vmem:[#allocation5 + $0x230] ss:$120 sps:$4 sm:$0xff]  }
  0xc9   :  { %2411 = vmatprep.subr.bf16.mxu1 %v3684_v57  ;;  %3389 = vmatprep.mubr.msk.bf16.mxu0 %vm2036_vm0, %v4132_v42  ;;  %v3766_v56 = vld [vmem:[#allocation5 + $0x238] ss:$120 sps:$4 sm:$0xff]   ;;  %v3771_v57 = vld [vmem:[#allocation5 + $0x144] ss:$120 sps:$4 sm:$0xff]  }
  0xca   :  { %3390 = vmatprep.mubr.msk.bf16.mxu1 %vm2036_vm0, %v4132_v42 }
  0xcb   :  { %2371 = vmatpush1.bf16.msra.mxu0 %v3679_v58  ;;  %v3774_v58 = vld [vmem:[#allocation5 + $0x14c] ss:$120 sps:$4 sm:$0xff]  }
  0xcc   :  { %2412 = vmatpush1.bf16.msra.mxu1 %v3682_v59  ;;  %2372 = vmatprep.subr.bf16.mxu0 %v3687_v60  ;;  %v3769_v59 = vld [vmem:[#allocation5 + $0x140] ss:$120 sps:$4 sm:$0xff]  }
  0xcd   :  { %2413 = vmatprep.subr.bf16.mxu1 %v3690_v61  ;;  %v3772_v60 = vld [vmem:[#allocation5 + $0x148] ss:$120 sps:$4 sm:$0xff]   ;;  %v3777_v61 = vld [vmem:[#allocation5 + $0x54] ss:$120 sps:$4 sm:$0xff]  }
  0xcf   :  { %2373 = vmatpush1.bf16.msra.mxu0 %v3685_v62  ;;  %v3780_v62 = vld [vmem:[#allocation5 + $0x5c] ss:$120 sps:$4 sm:$0xff]  }
  0xd0   :  { %2414 = vmatpush1.bf16.msra.mxu1 %v3688_v63  ;;  %2374 = vmatprep.subr.bf16.mxu0 %v3693_v0  ;;  %v3775_v63 = vld [vmem:[#allocation5 + $0x50] ss:$120 sps:$4 sm:$0xff]  }
  0xd1   :  { %2415 = vmatprep.subr.bf16.mxu1 %v3696_v1  ;;  %v3778_v0 = vld [vmem:[#allocation5 + $0x58] ss:$120 sps:$4 sm:$0xff]   ;;  %v3783_v1 = vld [vmem:[#allocation5 + $0x8c4] ss:$120 sps:$4 sm:$0xff]  }
  0xd3   :  { %2375 = vmatpush1.bf16.msra.mxu0 %v3691_v2  ;;  %v3786_v2 = vld [vmem:[#allocation5 + $0x8cc] ss:$120 sps:$4 sm:$0xff]  }
  0xd4   :  { %2416 = vmatpush1.bf16.msra.mxu1 %v3694_v3  ;;  %2376 = vmatprep.subr.bf16.mxu0 %v3699_v4  ;;  %v3781_v3 = vld [vmem:[#allocation5 + $0x8c0] ss:$120 sps:$4 sm:$0xff]  }
  0xd5   :  { %2417 = vmatprep.subr.bf16.mxu1 %v3702_v5  ;;  %v3784_v4 = vld [vmem:[#allocation5 + $0x8c8] ss:$120 sps:$4 sm:$0xff]   ;;  %v3789_v5 = vld [vmem:[#allocation5 + $0x7d4] ss:$120 sps:$4 sm:$0xff]  }
  0xd7   :  { %2377 = vmatpush1.bf16.msra.mxu0 %v3697_v6  ;;  %v3792_v6 = vld [vmem:[#allocation5 + $0x7dc] ss:$120 sps:$4 sm:$0xff]  }
  0xd8   :  { %2418 = vmatpush1.bf16.msra.mxu1 %v3700_v7  ;;  %2378 = vmatprep.subr.bf16.mxu0 %v3705_v8 }
  0xd9   :  { %2419 = vmatprep.subr.bf16.mxu1 %v3708_v9  ;;  %v3787_v9 = vld [vmem:[#allocation5 + $0x7d0] ss:$120 sps:$4 sm:$0xff]  }
  0xdb   :  { %2379 = vmatpush1.bf16.msra.mxu0 %v3703_v10  ;;  %v3790_v10 = vld [vmem:[#allocation5 + $0x7d8] ss:$120 sps:$4 sm:$0xff]  }
  0xdc   :  { %2420 = vmatpush1.bf16.msra.mxu1 %v3706_v11  ;;  %2380 = vmatprep.subr.bf16.mxu0 %v3711_v12 }
  0xdd   :  { %2421 = vmatprep.subr.bf16.mxu1 %v3714_v13  ;;  %v3795_v13 = vld [vmem:[#allocation5 + $0x6f4] ss:$120 sps:$4 sm:$0xff]  }
  0xdf   :  { %2381 = vmatpush1.bf16.msra.mxu0 %v3709_v14  ;;  %v3798_v14 = vld [vmem:[#allocation5 + $0x6fc] ss:$120 sps:$4 sm:$0xff]  }
  0xe0   :  { %2422 = vmatpush1.bf16.msra.mxu1 %v3712_v15  ;;  %2382 = vmatprep.subr.bf16.mxu0 %v3717_v16 }
  0xe1   :  { %2423 = vmatprep.subr.bf16.mxu1 %v3720_v17  ;;  %v3793_v17 = vld [vmem:[#allocation5 + $0x6f0] ss:$120 sps:$4 sm:$0xff]  }
  0xe3   :  { %2383 = vmatpush1.bf16.msra.mxu0 %v3715_v18  ;;  %v3796_v18 = vld [vmem:[#allocation5 + $0x6f8] ss:$120 sps:$4 sm:$0xff]  }
  0xe4   :  { %2424 = vmatpush1.bf16.msra.mxu1 %v3718_v19  ;;  %2396 = vmatprep.subr.bf16.mxu0 %v3723_v20  ;;  %v3801_v20 = vld [vmem:[#allocation5 + $0x604] ss:$120 sps:$4 sm:$0xff]  }
  0xe5   :  { %2437 = vmatprep.subr.bf16.mxu1 %v3726_v21  ;;  %v3804_v21 = vld [vmem:[#allocation5 + $0x60c] ss:$120 sps:$4 sm:$0xff]  }
  0xe7   :  { %2397 = vmatpush2.bf16.msra.mxu0 %v3721_v22 }
  0xe8   :  { %2438 = vmatpush2.bf16.msra.mxu1 %v3724_v23  ;;  %2398 = vmatprep.subr.bf16.mxu0 %v3729_v25  ;;  %v3799_v23 = vld [vmem:[#allocation5 + $0x600] ss:$120 sps:$4 sm:$0xff]  }
  0xe9   :  { %2439 = vmatprep.subr.bf16.mxu1 %v3732_v26  ;;  %v3802_v25 = vld [vmem:[#allocation5 + $0x608] ss:$120 sps:$4 sm:$0xff]   ;;  %v3807_v26 = vld [vmem:[#allocation5 + $0x514] ss:$120 sps:$4 sm:$0xff]  }
  0xeb   :  { %2399 = vmatpush2.bf16.msra.mxu0 %v3727_v27  ;;  %v3810_v27 = vld [vmem:[#allocation5 + $0x51c] ss:$120 sps:$4 sm:$0xff]  }
  0xec   :  { %2440 = vmatpush2.bf16.msra.mxu1 %v3730_v28  ;;  %2450 = vmatprep.subr.bf16.mxu0 %v3735_v29  ;;  %v3805_v28 = vld [vmem:[#allocation5 + $0x510] ss:$120 sps:$4 sm:$0xff]  }
  0xed   :  { %2491 = vmatprep.subr.bf16.mxu1 %v3738_v31  ;;  %v3808_v29 = vld [vmem:[#allocation5 + $0x518] ss:$120 sps:$4 sm:$0xff]   ;;  %v3813_v31 = vld [vmem:[#allocation5 + $0x424] ss:$120 sps:$4 sm:$0xff]  }
  0xee   :  { %2401 = vmatmul.mubr.bf16.vlgmr.msra.gmra.mxu0 %v4139_v51 }
  0xef   :  { %2442 = vmatmul.mubr.bf16.vlgmr.msra.gmra.mxu1 %v4139_v51  ;;  %2451 = vmatpush1.bf16.msra.mxu0 %v3733_v32  ;;  %v3816_v32 = vld [vmem:[#allocation5 + $0x42c] ss:$120 sps:$4 sm:$0xff]  }
  0xf0   :  { %2492 = vmatpush1.bf16.msra.mxu1 %v3736_v33  ;;  %2452 = vmatprep.subr.bf16.mxu0 %v3741_v34  ;;  %v4186_v33 = vsub.s32 0, %v4126_v30  ;;  %v3811_v34 = vld [vmem:[#allocation5 + $0x420] ss:$120 sps:$4 sm:$0xff]  }
  0xf1   :  { %2493 = vmatprep.subr.bf16.mxu1 %v3744_v36  ;;  %3391 = vmatprep.mubr.msk.bf16.mxu0 %vm2036_vm0, %v4132_v42  ;;  %v3814_v36 = vld [vmem:[#allocation5 + $0x428] ss:$120 sps:$4 sm:$0xff]  }
  0xf2   :  { %3392 = vmatprep.mubr.msk.bf16.mxu1 %vm2036_vm0, %v4132_v42 }
  0xf3   :  { %2453 = vmatpush1.bf16.msra.mxu0 %v3739_v37  ;;  %v4188_v37 = vld [vmem:[#allocation7] sm:$0xff] }
  0xf4   :  { %2494 = vmatpush1.bf16.msra.mxu1 %v3742_v38  ;;  %2454 = vmatprep.subr.bf16.mxu0 %v3747_v39  ;;  %v4191_v38 = vsub.s32 2, %v4126_v30  ;;  %v3819_v39 = vld [vmem:[#allocation5 + $0x334] ss:$120 sps:$4 sm:$0xff]  }
  0xf5   :  { %2495 = vmatprep.subr.bf16.mxu1 %v3750_v40  ;;  %v3822_v40 = vld [vmem:[#allocation5 + $0x33c] ss:$120 sps:$4 sm:$0xff]  }
  0xf7   :  { %2455 = vmatpush1.bf16.msra.mxu0 %v3745_v41  ;;  %v4194_v41 = vsub.s32 1, %v4126_v30 }
  0xf8   :  { %2496 = vmatpush1.bf16.msra.mxu1 %v3748_v43  ;;  %2456 = vmatprep.subr.bf16.mxu0 %v3753_v44  ;;  %v4197_v43 = vsub.s32 3, %v4126_v30  ;;  %v1889_v44 = vrot.slane %v4188_v37, %v4186_v33 }
  0xf9   :  { %2497 = vmatprep.subr.bf16.mxu1 %v3756_v45  ;;  %v3817_v45 = vld [vmem:[#allocation5 + $0x330] ss:$120 sps:$4 sm:$0xff]  }
  0xfb   :  { %2457 = vmatpush1.bf16.msra.mxu0 %v3751_v46  ;;  %v3820_v46 = vld [vmem:[#allocation5 + $0x338] ss:$120 sps:$4 sm:$0xff]  }
  0xfc   :  { %2498 = vmatpush1.bf16.msra.mxu1 %v3754_v47  ;;  %2458 = vmatprep.subr.bf16.mxu0 %v3759_v48  ;;  %v1897_v47 = vrot.slane %v4188_v37, %v4191_v38  ;;  %v3825_v48 = vld [vmem:[#allocation5 + $0x244] ss:$120 sps:$4 sm:$0xff]  }
  0xfd   :  { %2499 = vmatprep.subr.bf16.mxu1 %v3762_v49  ;;  %v3828_v49 = vld [vmem:[#allocation5 + $0x24c] ss:$120 sps:$4 sm:$0xff]  }
  0xff   :  { %2459 = vmatpush1.bf16.msra.mxu0 %v3757_v50  ;;  %v1893_v50 = vrot.slane %v4188_v37, %v4194_v41 }
 0x100   :  { %2500 = vmatpush1.bf16.msra.mxu1 %v3760_v52  ;;  %2460 = vmatprep.subr.bf16.mxu0 %v3765_v53  ;;  %v1901_v52 = vrot.slane %v4188_v37, %v4197_v43 }
 0x101   :  { %2501 = vmatprep.subr.bf16.mxu1 %v3768_v54  ;;  %v3823_v54 = vld [vmem:[#allocation5 + $0x240] ss:$120 sps:$4 sm:$0xff]  }
 0x103   :  { %2461 = vmatpush1.bf16.msra.mxu0 %v3763_v55  ;;  %v3826_v55 = vld [vmem:[#allocation5 + $0x248] ss:$120 sps:$4 sm:$0xff]  }
 0x104   :  { %2502 = vmatpush1.bf16.msra.mxu1 %v3766_v56  ;;  %2462 = vmatprep.subr.bf16.mxu0 %v3771_v57  ;;  %v3831_v57 = vld [vmem:[#allocation5 + $0x154] ss:$120 sps:$4 sm:$0xff]  }
 0x105   :  { %2503 = vmatprep.subr.bf16.mxu1 %v3774_v58  ;;  %v3834_v58 = vld [vmem:[#allocation5 + $0x15c] ss:$120 sps:$4 sm:$0xff]  }
 0x107   :  { %2463 = vmatpush1.bf16.msra.mxu0 %v3769_v59 }
 0x108   :  { %2504 = vmatpush1.bf16.msra.mxu1 %v3772_v60  ;;  %2464 = vmatprep.subr.bf16.mxu0 %v3777_v61 }
 0x109   :  { %2505 = vmatprep.subr.bf16.mxu1 %v3780_v62  ;;  %v3829_v62 = vld [vmem:[#allocation5 + $0x150] ss:$120 sps:$4 sm:$0xff]  }
 0x10b   :  { %2465 = vmatpush1.bf16.msra.mxu0 %v3775_v63  ;;  %v3832_v63 = vld [vmem:[#allocation5 + $0x158] ss:$120 sps:$4 sm:$0xff]  }
 0x10c   :  { %2506 = vmatpush1.bf16.msra.mxu1 %v3778_v0  ;;  %2478 = vmatprep.subr.bf16.mxu0 %v3783_v1  ;;  %v3837_v1 = vld [vmem:[#allocation5 + $0x64] ss:$120 sps:$4 sm:$0xff]  }
 0x10d   :  { %2519 = vmatprep.subr.bf16.mxu1 %v3786_v2  ;;  %v3840_v2 = vld [vmem:[#allocation5 + $0x6c] ss:$120 sps:$4 sm:$0xff]  }
 0x10e   :  { %v4171_v7 = vpop.f32.mrf.mxu0 }
 0x10f   :  { %v4173_v8 = vpop.f32.mrf.mxu1  ;;  %2479 = vmatpush2.bf16.msra.mxu0 %v3781_v3  ;;  %v2075_v53 = vadd.f32 %v4171_v7, %v1889_v44  ;;  %v4212_v7 = vsub.s32 4, %v4126_v30 }
 0x110   :  { %2520 = vmatpush2.bf16.msra.mxu1 %v3784_v4  ;;  %v4175_v11 = vpop.f32.mrf.mxu0  ;;  %2480 = vmatprep.subr.bf16.mxu0 %v3789_v5  ;;  %v2116_v56 = vadd.f32 %v4173_v8, %v1897_v47  ;;  %v3835_v5 = vld [vmem:[#allocation5 + $0x60] ss:$120 sps:$4 sm:$0xff]   ;;  %v4215_v8 = vsub.s32 6, %v4126_v30 }
 0x111   :  { %v4177_v12 = vpop.f32.mrf.mxu1  ;;  %2521 = vmatprep.subr.bf16.mxu1 %v3792_v6  ;;  %v2077_v59 = vadd.f32 %v4175_v11, %v1893_v50  ;;  %v3396_v61 = vmul.f32 -1.442695, %v2075_v53  ;;  %v3838_v6 = vld [vmem:[#allocation5 + $0x68] ss:$120 sps:$4 sm:$0xff]   ;;  %v4218_v11 = vsub.s32 5, %v4126_v30 }
 0x112   :  { %v2078_v15 = vpop.f32.mrf.mxu0  ;;  %v2118_v60 = vadd.f32 %v4177_v12, %v1901_v52  ;;  %v3398_v0 = vmul.f32 -1.442695, %v2116_v56  ;;  %v4221_v12 = vsub.s32 7, %v4126_v30 }
 0x113   :  { %v2119_v16 = vpop.f32.mrf.mxu1  ;;  %2481 = vmatpush2.bf16.msra.mxu0 %v3787_v9  ;;  %v3397_v3 = vmul.f32 -1.442695, %v2077_v59  ;;  %3883 = vpow2.f32 %v3396_v61  ;;  %v3843_v9 = vld [vmem:[#allocation5 + $0x8d4] ss:$120 sps:$4 sm:$0xff]   ;;  %v3841_v15 = vld [vmem:[#allocation5 + $0x8d0] ss:$120 sps:$4 sm:$0xff]  }
 0x114   :  { %2522 = vmatpush2.bf16.msra.mxu1 %v3790_v10  ;;  %v2079_v19 = vpop.f32.mrf.mxu0  ;;  %2532 = vmatprep.subr.bf16.mxu0 %v3795_v13  ;;  %v3399_v4 = vmul.f32 -1.442695, %v2118_v60  ;;  %3885 = vpow2.f32 %v3398_v0  ;;  %v3846_v10 = vld [vmem:[#allocation5 + $0x8dc] ss:$120 sps:$4 sm:$0xff]   ;;  %v1905_v13 = vrot.slane %v4188_v37, %v4212_v7  ;;  %v3844_v16 = vld [vmem:[#allocation5 + $0x8d8] ss:$120 sps:$4 sm:$0xff]   ;;  %v1917_v30 = vrot.slane %v4188_v37, %v4221_v12 }
 0x115   :  { %2573 = vmatprep.subr.bf16.mxu1 %v3798_v14  ;;  %v2120_v22 = vpop.f32.mrf.mxu1  ;;  %3887 = vpow2.f32 %v3397_v3  ;;  %v1913_v14 = vrot.slane %v4188_v37, %v4215_v8  ;;  %v1909_v19 = vrot.slane %v4188_v37, %v4218_v11  ;;  %v3859_v60 = vld [vmem:[#allocation5 + $0x520] ss:$120 sps:$4 sm:$0xff]   ;;  %v3864_v61 = vld [vmem:[#allocation5 + $0x434] ss:$120 sps:$4 sm:$0xff]   ;;  %v3867_v0 = vld [vmem:[#allocation5 + $0x344] ss:$120 sps:$4 sm:$0xff]  }
 0x116   :  { %2483 = vmatmul.mubr.bf16.vlgmr.msra.gmra.mxu0 %v4139_v51  ;;  %3889 = vpow2.f32 %v3399_v4 }
 0x117   :  { %2524 = vmatmul.mubr.bf16.vlgmr.msra.gmra.mxu1 %v4139_v51  ;;  %2533 = vmatpush1.bf16.msra.mxu0 %v3793_v17  ;;  %v3849_v17 = vld [vmem:[#allocation5 + $0x7e4] ss:$120 sps:$4 sm:$0xff]  }
 0x118   :  { %2574 = vmatpush1.bf16.msra.mxu1 %v3796_v18  ;;  %2534 = vmatprep.subr.bf16.mxu0 %v3801_v20  ;;  %v3852_v18 = vld [vmem:[#allocation5 + $0x7ec] ss:$120 sps:$4 sm:$0xff]  }
 0x119   :  { %2575 = vmatprep.subr.bf16.mxu1 %v3804_v21  ;;  %3393 = vmatprep.mubr.msk.bf16.mxu0 %vm2036_vm0, %v4132_v42 }
 0x11a   :  { %3394 = vmatprep.mubr.msk.bf16.mxu1 %vm2036_vm0, %v4132_v42 }
 0x11b   :  { %2535 = vmatpush1.bf16.msra.mxu0 %v3799_v23 }
 0x11c   :  { %2576 = vmatpush1.bf16.msra.mxu1 %v3802_v25  ;;  %2536 = vmatprep.subr.bf16.mxu0 %v3807_v26  ;;  %v3847_v25 = vld [vmem:[#allocation5 + $0x7e0] ss:$120 sps:$4 sm:$0xff]  }
 0x11d   :  { %2577 = vmatprep.subr.bf16.mxu1 %v3810_v27  ;;  %v3850_v26 = vld [vmem:[#allocation5 + $0x7e8] ss:$120 sps:$4 sm:$0xff]  }
 0x11f   :  { %2537 = vmatpush1.bf16.msra.mxu0 %v3805_v28 }
 0x120   :  { %2578 = vmatpush1.bf16.msra.mxu1 %v3808_v29  ;;  %2538 = vmatprep.subr.bf16.mxu0 %v3813_v31  ;;  %v3855_v29 = vld [vmem:[#allocation5 + $0x704] ss:$120 sps:$4 sm:$0xff]  }
 0x121   :  { %2579 = vmatprep.subr.bf16.mxu1 %v3816_v32 }
 0x123   :  { %2539 = vmatpush1.bf16.msra.mxu0 %v3811_v34 }
 0x124   :  { %2580 = vmatpush1.bf16.msra.mxu1 %v3814_v36  ;;  %2540 = vmatprep.subr.bf16.mxu0 %v3819_v39 }
 0x125   :  { %2581 = vmatprep.subr.bf16.mxu1 %v3822_v40 }
 0x127   :  { %2541 = vmatpush1.bf16.msra.mxu0 %v3817_v45  ;;  %v3853_v45 = vld [vmem:[#allocation5 + $0x700] ss:$120 sps:$4 sm:$0xff]  }
 0x128   :  { %2582 = vmatpush1.bf16.msra.mxu1 %v3820_v46  ;;  %2542 = vmatprep.subr.bf16.mxu0 %v3825_v48  ;;  %v3884_v46 = vpop.eup %3883  ;;  %v3858_v48 = vld [vmem:[#allocation5 + $0x614] ss:$120 sps:$4 sm:$0xff]  }
 0x129   :  { %2583 = vmatprep.subr.bf16.mxu1 %v3828_v49  ;;  %v3886_v50 = vpop.eup %3885 }
 0x12a   :  { %v3888_v52 = vpop.eup %3887  ;;  %v2747_v56 = vadd.f32 1.0, %v3886_v50 }
 0x12b   :  { %2543 = vmatpush1.bf16.msra.mxu0 %v3823_v54  ;;  %v3890_v53 = vpop.eup %3889  ;;  %v2745_v54 = vadd.f32 1.0, %v3884_v46 }
 0x12c   :  { %2584 = vmatpush1.bf16.msra.mxu1 %v3826_v55  ;;  %2544 = vmatprep.subr.bf16.mxu0 %v3831_v57  ;;  %v3856_v55 = vld [vmem:[#allocation5 + $0x610] ss:$120 sps:$4 sm:$0xff]   ;;  %v3861_v57 = vld [vmem:[#allocation5 + $0x524] ss:$120 sps:$4 sm:$0xff]   ;;  %v2748_v59 = vadd.f32 1.0, %v3890_v53 }
 0x12d   :  { %2585 = vmatprep.subr.bf16.mxu1 %v3834_v58  ;;  %v2746_v58 = vadd.f32 1.0, %v3888_v52 }
 0x12f   :  { %2545 = vmatpush1.bf16.msra.mxu0 %v3829_v62  ;;  %v3862_v62 = vld [vmem:[#allocation5 + $0x430] ss:$120 sps:$4 sm:$0xff]  }
 0x130   :  { %2586 = vmatpush1.bf16.msra.mxu1 %v3832_v63  ;;  %2546 = vmatprep.subr.bf16.mxu0 %v3837_v1 }
 0x131   :  { %2587 = vmatprep.subr.bf16.mxu1 %v3840_v2 }
 0x133   :  { %2547 = vmatpush1.bf16.msra.mxu0 %v3835_v5 }
 0x134   :  { %2588 = vmatpush1.bf16.msra.mxu1 %v3838_v6  ;;  %2560 = vmatprep.subr.bf16.mxu0 %v3843_v9  ;;  %v3865_v6 = vld [vmem:[#allocation5 + $0x340] ss:$120 sps:$4 sm:$0xff]  }
 0x135   :  { %2601 = vmatprep.subr.bf16.mxu1 %v3846_v10  ;;  %v3870_v10 = vld [vmem:[#allocation5 + $0x254] ss:$120 sps:$4 sm:$0xff]  }
 0x136   :  { %v2156_v20 = vpop.f32.mrf.mxu0 }
 0x137   :  { %v2197_v21 = vpop.f32.mrf.mxu1  ;;  %v2157_v22 = vadd.f32 %v2156_v20, %v1905_v13  ;;  %2561 = vmatpush2.bf16.msra.mxu0 %v3841_v15  ;;  %v3868_v13 = vld [vmem:[#allocation5 + $0x250] ss:$120 sps:$4 sm:$0xff]   ;;  %v3873_v15 = vld [vmem:[#allocation5 + $0x164] ss:$120 sps:$4 sm:$0xff]  }
 0x138   :  { %v2198_v23 = vadd.f32 %v2197_v21, %v1913_v14  ;;  %2602 = vmatpush2.bf16.msra.mxu1 %v3844_v16  ;;  %v2158_v27 = vpop.f32.mrf.mxu0  ;;  %2562 = vmatprep.subr.bf16.mxu0 %v3849_v17 }
 0x139   :  { %v2199_v28 = vpop.f32.mrf.mxu1  ;;  %2603 = vmatprep.subr.bf16.mxu1 %v3852_v18  ;;  %v3400_v31 = vmul.f32 -1.442695, %v2157_v22  ;;  %v2159_v34 = vadd.f32 %v2158_v27, %v1909_v19  ;;  %v3871_v19 = vld [vmem:[#allocation5 + $0x160] ss:$120 sps:$4 sm:$0xff]   ;;  %v3874_v22 = vld [vmem:[#allocation5 + $0x70] ss:$120 sps:$4 sm:$0xff]  }
 0x13a   :  { %v3402_v32 = vmul.f32 -1.442695, %v2198_v23  ;;  %v2200_v36 = vadd.f32 %v2199_v28, %v1917_v30  ;;  %v2160_v39 = vpop.f32.mrf.mxu0  ;;  %v3876_v30 = vld [vmem:[#allocation5 + $0x74] ss:$120 sps:$4 sm:$0xff]  }
 0x13b   :  { %v2201_v40 = vpop.f32.mrf.mxu1  ;;  %3891 = vpow2.f32 %v3400_v31  ;;  %v3401_v37 = vmul.f32 -1.442695, %v2159_v34  ;;  %2563 = vmatpush2.bf16.msra.mxu0 %v3847_v25  ;;  %v3879_v25 = vld [vmem:[#allocation5 + $0x8e4] ss:$120 sps:$4 sm:$0xff]  }
 0x13c   :  { %v3403_v44 = vmul.f32 -1.442695, %v2200_v36  ;;  %2604 = vmatpush2.bf16.msra.mxu1 %v3850_v26  ;;  %3893 = vpow2.f32 %v3402_v32  ;;  %v2161_v47 = vpop.f32.mrf.mxu0  ;;  %2614 = vmatprep.subr.bf16.mxu0 %v3855_v29  ;;  %v3877_v32 = vld [vmem:[#allocation5 + $0x8e0] ss:$120 sps:$4 sm:$0xff]   ;;  %v3882_v36 = vld [vmem:[#allocation5 + $0x7f4] ss:$120 sps:$4 sm:$0xff]  }
 0x13d   :  { %v2202_v49 = vpop.f32.mrf.mxu1  ;;  %3895 = vpow2.f32 %v3401_v37  ;;  %v3880_v47 = vld [vmem:[#allocation5 + $0x7f0] ss:$120 sps:$4 sm:$0xff]  }
 0x13e   :  { %3897 = vpow2.f32 %v3403_v44  ;;  %2565 = vmatmul.mubr.bf16.vlgmr.msra.gmra.mxu0 %v4139_v51 }
 0x13f   :  { %2606 = vmatmul.mubr.bf16.vlgmr.msra.gmra.mxu1 %v4139_v51  ;;  %2615 = vmatpush1.bf16.msra.mxu0 %v3853_v45  ;;  %3899 = vrcp.f32 %v2745_v54 }
 0x140   :  { %3395 = vmatprep.mubr.msk.bf16.mxu0 %vm2036_vm0, %v4132_v42  ;;  %2616 = vmatprep.subr.bf16.mxu0 %v3858_v48  ;;  %3901 = vrcp.f32 %v2747_v56 }
 0x141   :  { %3903 = vrcp.f32 %v2746_v58 }
 0x142   :  { %3905 = vrcp.f32 %v2748_v59  ;;  %v355_v59 = vld [vmem:[#allocation7 + $0x8] sm:$0xff] }
 0x143   :  { %2617 = vmatpush1.bf16.msra.mxu0 %v3856_v55 }
 0x144   :  { %2618 = vmatprep.subr.bf16.mxu0 %v3861_v57 }
 0x147   :  { %2619 = vmatpush1.bf16.msra.mxu0 %v3859_v60  ;;  %v1921_v60 = vrot.slane %v355_v59, %v4186_v33 }
 0x148   :  { %v3892_v63 = vpop.eup %3891  ;;  %2620 = vmatprep.subr.bf16.mxu0 %v3864_v61  ;;  %v1929_v61 = vrot.slane %v355_v59, %v4191_v38 }
 0x149   :  { %v3894_v1 = vpop.eup %3893  ;;  %v2749_v42 = vadd.f32 1.0, %v3892_v63  ;;  %v1933_v63 = vrot.slane %v355_v59, %v4197_v43 }
 0x14a   :  { %v3896_v2 = vpop.eup %3895  ;;  %v2751_v3 = vadd.f32 1.0, %v3894_v1 }
 0x14b   :  { %v3898_v4 = vpop.eup %3897  ;;  %3907 = vrcp.f32 %v2749_v42  ;;  %v2750_v5 = vadd.f32 1.0, %v3896_v2  ;;  %2621 = vmatpush1.bf16.msra.mxu0 %v3862_v62  ;;  %v1925_v62 = vrot.slane %v355_v59, %v4194_v41 }
 0x14c   :  { %3909 = vrcp.f32 %v2751_v3  ;;  %v2752_v9 = vadd.f32 1.0, %v3898_v4  ;;  %2622 = vmatprep.subr.bf16.mxu0 %v3867_v0  ;;  %v3900_v14 = vpop.eup %3899 }
 0x14d   :  { %3911 = vrcp.f32 %v2750_v5  ;;  %v3902_v16 = vpop.eup %3901 }
 0x14e   :  { %3913 = vrcp.f32 %v2752_v9  ;;  %v3904_v17 = vpop.eup %3903  ;;  %v1945_v9 = vrot.slane %v355_v59, %v4215_v8 }
 0x14f   :  { %2623 = vmatpush1.bf16.msra.mxu0 %v3865_v6  ;;  %v3906_v18 = vpop.eup %3905  ;;  %v2865_v20 = vcombine.low %v3900_v14, %v3904_v17 }
 0x150   :  { %2624 = vmatprep.subr.bf16.mxu0 %v3870_v10  ;;  %v2866_v21 = vcombine.low %v3902_v16, %v3906_v18  ;;  %v1941_v10 = vrot.slane %v355_v59, %v4218_v11 }
 0x151   :  { %v2875_v28 = vrot.slane %v2865_v20, %v4129_v35 }
 0x152   :  { %v2882_v29 = vrot.slane %v2866_v21, %v4129_v35 }
 0x153   :  { %2625 = vmatpush1.bf16.msra.mxu0 %v3868_v13  ;;  %v1949_v13 = vrot.slane %v355_v59, %v4221_v12 }
 0x154   :  { %2626 = vmatprep.subr.bf16.mxu0 %v3873_v15  ;;  %v2897_v46 = vcombine.low %v2875_v28, %v2882_v29 }
 0x156   :  { %v2905_v54 = vrot.slane %v2897_v46, %v4129_v35 }
 0x157   :  { %2627 = vmatpush1.bf16.msra.mxu0 %v3871_v19 }
 0x158   :  { %v3908_v23 = vpop.eup %3907  ;;  %2628 = vmatprep.subr.bf16.mxu0 %v3876_v30 }
 0x159   :  { %v3910_v26 = vpop.eup %3909 }
 0x15a   :  { %v3912_v27 = vpop.eup %3911 }
 0x15b   :  { %v3914_v31 = vpop.eup %3913  ;;  %2629 = vmatpush1.bf16.msra.mxu0 %v3874_v22  ;;  %v2867_v34 = vcombine.low %v3908_v23, %v3912_v27 }
 0x15c   :  { %2642 = vmatprep.subr.bf16.mxu0 %v3879_v25  ;;  %v2868_v39 = vcombine.low %v3910_v26, %v3914_v31 }
 0x15d   :  { %v2889_v40 = vrot.slane %v2867_v34, %v4129_v35 }
 0x15e   :  { %v2238_v37 = vpop.f32.mrf.mxu0  ;;  %v2896_v45 = vrot.slane %v2868_v39, %v4129_v35 }
 0x15f   :  { %v2279_v44 = vpop.f32.mrf.mxu1  ;;  %2643 = vmatpush2.bf16.msra.mxu0 %v3877_v32  ;;  %v2239_v0 = vadd.f32 %v2238_v37, %v1921_v60 }
 0x160   :  { %v2240_v48 = vpop.f32.mrf.mxu0  ;;  %2644 = vmatprep.subr.bf16.mxu0 %v3882_v36  ;;  %v2898_v50 = vcombine.low %v2889_v40, %v2896_v45  ;;  %v2280_v1 = vadd.f32 %v2279_v44, %v1929_v61 }
 0x161   :  { %v2281_v49 = vpop.f32.mrf.mxu1  ;;  %v2241_v42 = vadd.f32 %v2240_v48, %v1925_v62  ;;  %v3404_v3 = vmul.f32 -1.442695, %v2239_v0 }
 0x162   :  { %v2242_v52 = vpop.f32.mrf.mxu0  ;;  %v2912_v55 = vrot.slane %v2898_v50, %v4129_v35  ;;  %v2282_v2 = vadd.f32 %v2281_v49, %v1933_v63  ;;  %v3406_v4 = vmul.f32 -1.442695, %v2280_v1 }
 0x163   :  { %v2283_v53 = vpop.f32.mrf.mxu1  ;;  %2645 = vmatpush2.bf16.msra.mxu0 %v3880_v47  ;;  %v3405_v5 = vmul.f32 -1.442695, %v2241_v42  ;;  %3915 = vpow2.f32 %v3404_v3 }
 0x164   :  { %v2243_v56 = vpop.f32.mrf.mxu0  ;;  %v2913_v58 = vcombine.low %v2905_v54, %v2912_v55  ;;  %v3407_v6 = vmul.f32 -1.442695, %v2282_v2  ;;  %3917 = vpow2.f32 %v3406_v4 }
 0x165   :  { %v2284_v57 = vpop.f32.mrf.mxu1  ;;  %3919 = vpow2.f32 %v3405_v5 }
 0x166   :  { %2647 = vmatmul.mubr.bf16.vlgmr.msra.gmra.mxu0 %v4139_v51  ;;  %3056 = vst [vmem:[#allocation8] sm:$0xff] %v2913_v58  ;;  %3921 = vpow2.f32 %v3407_v6  ;;  %v1937_v51 = vrot.slane %v355_v59, %v4212_v7 }
 0x170   :  { %v3916_v28 = vpop.eup %3915 }
 0x171   :  { %v3918_v32 = vpop.eup %3917  ;;  %v2753_v39 = vadd.f32 1.0, %v3916_v28 }
 0x172   :  { %v3920_v34 = vpop.eup %3919  ;;  %v2755_v40 = vadd.f32 1.0, %v3918_v32 }
 0x173   :  { %v3922_v36 = vpop.eup %3921  ;;  %v2754_v37 = vadd.f32 1.0, %v3920_v34 }
 0x174   :  { %v2756_v44 = vadd.f32 1.0, %v3922_v36 }
 0x186   :  { %v2320_v14 = vpop.f32.mrf.mxu0 }
 0x187   :  { %v2361_v15 = vpop.f32.mrf.mxu1  ;;  %v2321_v16 = vadd.f32 %v2320_v14, %v1937_v51 }
 0x188   :  { %v2362_v17 = vadd.f32 %v2361_v15, %v1945_v9  ;;  %v2322_v18 = vpop.f32.mrf.mxu0 }
 0x189   :  { %v2363_v19 = vpop.f32.mrf.mxu1  ;;  %v3408_v30 = vmul.f32 -1.442695, %v2321_v16  ;;  %v2323_v21 = vadd.f32 %v2322_v18, %v1941_v10 }
 0x18a   :  { %v3410_v20 = vmul.f32 -1.442695, %v2362_v17  ;;  %v2364_v22 = vadd.f32 %v2363_v19, %v1949_v13  ;;  %v2324_v23 = vpop.f32.mrf.mxu0 }
 0x18b   :  { %v2365_v25 = vpop.f32.mrf.mxu1  ;;  %3923 = vpow2.f32 %v3408_v30  ;;  %v3409_v26 = vmul.f32 -1.442695, %v2323_v21 }
 0x18c   :  { %v3411_v27 = vmul.f32 -1.442695, %v2364_v22  ;;  %3925 = vpow2.f32 %v3410_v20  ;;  %v2325_v29 = vpop.f32.mrf.mxu0  ;;  %v356_v20 = vld [vmem:[#allocation7 + $0x10] sm:$0xff] }
 0x18d   :  { %v2366_v31 = vpop.f32.mrf.mxu1  ;;  %3927 = vpow2.f32 %v3409_v26  ;;  %v1953_v21 = vrot.slane %v356_v20, %v4186_v33  ;;  %v1961_v22 = vrot.slane %v356_v20, %v4191_v38  ;;  %v1957_v23 = vrot.slane %v356_v20, %v4194_v41 }
 0x18e   :  { %3929 = vpow2.f32 %v3411_v27  ;;  %v1965_v25 = vrot.slane %v356_v20, %v4197_v43 }
 0x18f   :  { %3931 = vrcp.f32 %v2753_v39  ;;  %v1969_v39 = vrot.slane %v356_v20, %v4212_v7 }
 0x190   :  { %3933 = vrcp.f32 %v2755_v40  ;;  %v1977_v40 = vrot.slane %v356_v20, %v4215_v8 }
 0x191   :  { %3935 = vrcp.f32 %v2754_v37  ;;  %v1973_v37 = vrot.slane %v356_v20, %v4218_v11 }
 0x192   :  { %3937 = vrcp.f32 %v2756_v44  ;;  %v1981_v44 = vrot.slane %v356_v20, %v4221_v12 }
 0x198   :  { %v3924_v45 = vpop.eup %3923 }
 0x199   :  { %v3926_v46 = vpop.eup %3925  ;;  %v2757_v47 = vadd.f32 1.0, %v3924_v45 }
 0x19a   :  { %v3928_v48 = vpop.eup %3927  ;;  %v2759_v49 = vadd.f32 1.0, %v3926_v46 }
 0x19b   :  { %v3930_v50 = vpop.eup %3929  ;;  %3939 = vrcp.f32 %v2757_v47  ;;  %v2758_v52 = vadd.f32 1.0, %v3928_v48 }
 0x19c   :  { %3941 = vrcp.f32 %v2759_v49  ;;  %v2760_v53 = vadd.f32 1.0, %v3930_v50  ;;  %v3932_v54 = vpop.eup %3931 }
 0x19d   :  { %3943 = vrcp.f32 %v2758_v52  ;;  %v3934_v55 = vpop.eup %3933 }
 0x19e   :  { %3945 = vrcp.f32 %v2760_v53  ;;  %v3936_v56 = vpop.eup %3935 }
 0x19f   :  { %v3938_v57 = vpop.eup %3937  ;;  %v2914_v58 = vcombine.low %v3932_v54, %v3936_v56 }
 0x1a0   :  { %v2915_v59 = vcombine.low %v3934_v55, %v3938_v57 }
 0x1a1   :  { %v2924_v63 = vrot.slane %v2914_v58, %v4129_v35 }
 0x1a2   :  { %v2931_v0 = vrot.slane %v2915_v59, %v4129_v35 }
 0x1a4   :  { %v2946_v51 = vcombine.low %v2924_v63, %v2931_v0 }
 0x1a6   :  { %v2954_v16 = vrot.slane %v2946_v51, %v4129_v35 }
 0x1a8   :  { %v3940_v60 = vpop.eup %3939 }
 0x1a9   :  { %v3942_v61 = vpop.eup %3941 }
 0x1aa   :  { %v3944_v62 = vpop.eup %3943 }
 0x1ab   :  { %v3946_v1 = vpop.eup %3945  ;;  %v2916_v42 = vcombine.low %v3940_v60, %v3944_v62 }
 0x1ac   :  { %v2917_v2 = vcombine.low %v3942_v61, %v3946_v1 }
 0x1ad   :  { %v2938_v3 = vrot.slane %v2916_v42, %v4129_v35 }
 0x1ae   :  { %v2402_v4 = vpop.f32.mrf.mxu0  ;;  %v2945_v6 = vrot.slane %v2917_v2, %v4129_v35 }
 0x1af   :  { %v2443_v5 = vpop.f32.mrf.mxu1  ;;  %v2403_v26 = vadd.f32 %v2402_v4, %v1953_v21 }
 0x1b0   :  { %v2404_v9 = vpop.f32.mrf.mxu0  ;;  %v2947_v13 = vcombine.low %v2938_v3, %v2945_v6  ;;  %v2444_v27 = vadd.f32 %v2443_v5, %v1961_v22 }
 0x1b1   :  { %v2445_v10 = vpop.f32.mrf.mxu1  ;;  %v2405_v28 = vadd.f32 %v2404_v9, %v1957_v23  ;;  %v3412_v31 = vmul.f32 -1.442695, %v2403_v26 }
 0x1b2   :  { %v2406_v14 = vpop.f32.mrf.mxu0  ;;  %v2961_v17 = vrot.slane %v2947_v13, %v4129_v35  ;;  %v2446_v29 = vadd.f32 %v2445_v10, %v1965_v25  ;;  %v3414_v32 = vmul.f32 -1.442695, %v2444_v27 }
 0x1b3   :  { %v2447_v15 = vpop.f32.mrf.mxu1  ;;  %v3413_v34 = vmul.f32 -1.442695, %v2405_v28  ;;  %3947 = vpow2.f32 %v3412_v31 }
 0x1b4   :  { %v2407_v18 = vpop.f32.mrf.mxu0  ;;  %v2962_v30 = vcombine.low %v2954_v16, %v2961_v17  ;;  %v3415_v36 = vmul.f32 -1.442695, %v2446_v29  ;;  %3949 = vpow2.f32 %v3414_v32 }
 0x1b5   :  { %v2448_v19 = vpop.f32.mrf.mxu1  ;;  %3951 = vpow2.f32 %v3413_v34 }
 0x1b6   :  { %3057 = vst [vmem:[#allocation8 + $0x8] sm:$0xff] %v2962_v30  ;;  %3953 = vpow2.f32 %v3415_v36 }
 0x1c0   :  { %v3948_v8 = vpop.eup %3947 }
 0x1c1   :  { %v3950_v12 = vpop.eup %3949  ;;  %v2761_v0 = vadd.f32 1.0, %v3948_v8 }
 0x1c2   :  { %v3952_v62 = vpop.eup %3951  ;;  %v2763_v1 = vadd.f32 1.0, %v3950_v12 }
 0x1c3   :  { %v3954_v63 = vpop.eup %3953  ;;  %v2762_v42 = vadd.f32 1.0, %v3952_v62 }
 0x1c4   :  { %v2764_v2 = vadd.f32 1.0, %v3954_v63 }
 0x1d6   :  { %v2484_v45 = vpop.f32.mrf.mxu0 }
 0x1d7   :  { %v2525_v46 = vpop.f32.mrf.mxu1  ;;  %v2485_v47 = vadd.f32 %v2484_v45, %v1969_v39 }
 0x1d8   :  { %v2526_v48 = vadd.f32 %v2525_v46, %v1977_v40  ;;  %v2486_v49 = vpop.f32.mrf.mxu0 }
 0x1d9   :  { %v2527_v50 = vpop.f32.mrf.mxu1  ;;  %v3416_v52 = vmul.f32 -1.442695, %v2485_v47  ;;  %v2487_v54 = vadd.f32 %v2486_v49, %v1973_v37 }
 0x1da   :  { %v3418_v53 = vmul.f32 -1.442695, %v2526_v48  ;;  %v2528_v55 = vadd.f32 %v2527_v50, %v1981_v44  ;;  %v2488_v56 = vpop.f32.mrf.mxu0  ;;  %v357_v50 = vld [vmem:[#allocation7 + $0x18] sm:$0x3f] }
 0x1db   :  { %v2529_v57 = vpop.f32.mrf.mxu1  ;;  %3955 = vpow2.f32 %v3416_v52  ;;  %v3417_v58 = vmul.f32 -1.442695, %v2487_v54  ;;  %v1985_v52 = vrot.slane %v357_v50, %v4186_v33  ;;  %v1989_v54 = vrot.slane %v357_v50, %v4194_v41 }
 0x1dc   :  { %v3419_v59 = vmul.f32 -1.442695, %v2528_v55  ;;  %3957 = vpow2.f32 %v3418_v53  ;;  %v2489_v60 = vpop.f32.mrf.mxu0  ;;  %v1993_v53 = vrot.slane %v357_v50, %v4191_v38  ;;  %v1997_v55 = vrot.slane %v357_v50, %v4197_v43 }
 0x1dd   :  { %v2530_v61 = vpop.f32.mrf.mxu1  ;;  %3959 = vpow2.f32 %v3417_v58  ;;  %v2001_v33 = vrot.slane %v357_v50, %v4212_v7  ;;  %v2005_v38 = vrot.slane %v357_v50, %v4218_v11 }
 0x1de   :  { %3961 = vpow2.f32 %v3419_v59 }
 0x1df   :  { %3963 = vrcp.f32 %v2761_v0 }
 0x1e0   :  { %3965 = vrcp.f32 %v2763_v1 }
 0x1e1   :  { %3967 = vrcp.f32 %v2762_v42 }
 0x1e2   :  { %3969 = vrcp.f32 %v2764_v2 }
 0x1e8   :  { %v3956_v3 = vpop.eup %3955 }
 0x1e9   :  { %v3958_v4 = vpop.eup %3957  ;;  %v2765_v5 = vadd.f32 1.0, %v3956_v3 }
 0x1ea   :  { %v3960_v6 = vpop.eup %3959  ;;  %v2767_v51 = vadd.f32 1.0, %v3958_v4 }
 0x1eb   :  { %v3962_v9 = vpop.eup %3961  ;;  %3971 = vrcp.f32 %v2765_v5  ;;  %v2766_v10 = vadd.f32 1.0, %v3960_v6 }
 0x1ec   :  { %3973 = vrcp.f32 %v2767_v51  ;;  %v2768_v13 = vadd.f32 1.0, %v3962_v9  ;;  %v3964_v14 = vpop.eup %3963 }
 0x1ed   :  { %3975 = vrcp.f32 %v2766_v10  ;;  %v3966_v15 = vpop.eup %3965 }
 0x1ee   :  { %3977 = vrcp.f32 %v2768_v13  ;;  %v3968_v16 = vpop.eup %3967 }
 0x1ef   :  { %v3970_v17 = vpop.eup %3969  ;;  %v2963_v18 = vcombine.low %v3964_v14, %v3968_v16 }
 0x1f0   :  { %v2964_v19 = vcombine.low %v3966_v15, %v3970_v17 }
 0x1f1   :  { %v2973_v22 = vrot.slane %v2963_v18, %v4129_v35 }
 0x1f2   :  { %v2980_v23 = vrot.slane %v2964_v19, %v4129_v35 }
 0x1f4   :  { %v2995_v34 = vcombine.low %v2973_v22, %v2980_v23 }
 0x1f6   :  { %v3003_v45 = vrot.slane %v2995_v34, %v4129_v35 }
 0x1f8   :  { %v3972_v30 = vpop.eup %3971 }
 0x1f9   :  { %v3974_v20 = vpop.eup %3973 }
 0x1fa   :  { %v3976_v21 = vpop.eup %3975 }
 0x1fb   :  { %v3978_v25 = vpop.eup %3977  ;;  %v2965_v26 = vcombine.low %v3972_v30, %v3976_v21 }
 0x1fc   :  { %v2966_v27 = vcombine.low %v3974_v20, %v3978_v25 }
 0x1fd   :  { %v2987_v28 = vrot.slane %v2965_v26, %v4129_v35 }
 0x1fe   :  { %v2566_v29 = vpop.f32.mrf.mxu0  ;;  %v2994_v32 = vrot.slane %v2966_v27, %v4129_v35 }
 0x1ff   :  { %v2607_v31 = vpop.f32.mrf.mxu1  ;;  %v2567_v56 = vadd.f32 %v2566_v29, %v1985_v52 }
 0x200   :  { %v2568_v36 = vpop.f32.mrf.mxu0  ;;  %v2996_v40 = vcombine.low %v2987_v28, %v2994_v32  ;;  %v2608_v57 = vadd.f32 %v2607_v31, %v1993_v53 }
 0x201   :  { %v2609_v39 = vpop.f32.mrf.mxu1  ;;  %v2569_v58 = vadd.f32 %v2568_v36, %v1989_v54  ;;  %v3420_v8 = vmul.f32 -1.442695, %v2567_v56 }
 0x202   :  { %v2570_v37 = vpop.f32.mrf.mxu0  ;;  %v3010_v46 = vrot.slane %v2996_v40, %v4129_v35  ;;  %v2610_v59 = vadd.f32 %v2609_v39, %v1997_v55  ;;  %v3422_v60 = vmul.f32 -1.442695, %v2608_v57 }
 0x203   :  { %v2611_v44 = vpop.f32.mrf.mxu1  ;;  %v3421_v61 = vmul.f32 -1.442695, %v2569_v58  ;;  %3979 = vpow2.f32 %v3420_v8 }
 0x204   :  { %v2571_v47 = vpop.f32.mrf.mxu0  ;;  %v3011_v49 = vcombine.low %v3003_v45, %v3010_v46  ;;  %v3423_v12 = vmul.f32 -1.442695, %v2610_v59  ;;  %3981 = vpow2.f32 %v3422_v60 }
 0x205   :  { %v2612_v48 = vpop.f32.mrf.mxu1  ;;  %3983 = vpow2.f32 %v3421_v61 }
 0x206   :  { %3058 = vst [vmem:[#allocation8 + $0x10] sm:$0xff] %v3011_v49  ;;  %3985 = vpow2.f32 %v3423_v12 }
 0x210   :  { %v3980_v43 = vpop.eup %3979 }
 0x211   :  { %v3982_v42 = vpop.eup %3981  ;;  %v2769_v6 = vadd.f32 1.0, %v3980_v43 }
 0x212   :  { %v3984_v3 = vpop.eup %3983  ;;  %v2771_v9 = vadd.f32 1.0, %v3982_v42 }
 0x213   :  { %v3986_v5 = vpop.eup %3985  ;;  %v2770_v10 = vadd.f32 1.0, %v3984_v3 }
 0x214   :  { %v2772_v7 = vadd.f32 1.0, %v3986_v5 }
 0x226   :  { %v2648_v62 = vpop.f32.mrf.mxu0 }
 0x227   :  { %v2649_v41 = vadd.f32 %v2648_v62, %v2001_v33 }
 0x228   :  { %v2650_v63 = vpop.f32.mrf.mxu0 }
 0x229   :  { %v3424_v0 = vmul.f32 -1.442695, %v2649_v41  ;;  %v2651_v1 = vadd.f32 %v2650_v63, %v2005_v38 }
 0x22a   :  { %v2652_v2 = vpop.f32.mrf.mxu0 }
 0x22b   :  { %3987 = vpow2.f32 %v3424_v0  ;;  %v3425_v4 = vmul.f32 -1.442695, %v2651_v1 }
 0x22c   :  { %v2653_v51 = vpop.f32.mrf.mxu0 }
 0x22d   :  { %3989 = vpow2.f32 %v3425_v4 }
 0x22e   :  { %3991 = vrcp.f32 %v2769_v6 }
 0x22f   :  { %3993 = vrcp.f32 %v2771_v9 }
 0x230   :  { %3995 = vrcp.f32 %v2770_v10 }
 0x231   :  { %3997 = vrcp.f32 %v2772_v7 }
 0x238   :  { %v3988_v11 = vpop.eup %3987 }
 0x239   :  { %v2773_v13 = vadd.f32 1.0, %v3988_v11 }
 0x23a   :  { %v3990_v14 = vpop.eup %3989 }
 0x23b   :  { %v2774_v15 = vadd.f32 1.0, %v3990_v14  ;;  %3999 = vrcp.f32 %v2773_v13  ;;  %v3992_v16 = vpop.eup %3991 }
 0x23c   :  { %v3994_v17 = vpop.eup %3993 }
 0x23d   :  { %4001 = vrcp.f32 %v2774_v15  ;;  %v3996_v18 = vpop.eup %3995 }
 0x23e   :  { %v3998_v19 = vpop.eup %3997  ;;  %v3012_v30 = vcombine.low %v3992_v16, %v3996_v18 }
 0x23f   :  { %v3013_v20 = vcombine.low %v3994_v17, %v3998_v19 }
 0x240   :  { %v3021_v21 = vrot.slane %v3012_v30, %v4129_v35 }
 0x241   :  { %v3028_v22 = vrot.slane %v3013_v20, %v4129_v35 }
 0x243   :  { %v3036_v27 = vcombine.low %v3021_v21, %v3028_v22 }
 0x245   :  { %v3043_v29 = vrot.slane %v3036_v27, %v4129_v35 }
 0x248   :  { %v4000_v23 = vpop.eup %3999 }
 0x24a   :  { %v4002_v25 = vpop.eup %4001 }
 0x24b   :  { %v3014_v26 = vcombine.low %v4000_v23, %v4002_v25 }
 0x24d   :  { %v3035_v28 = vrot.slane %v3014_v26, %v4129_v35 }
 0x24f   :  { %v3050_v31 = vrot.slane %v3035_v28, %v4129_v35 }
 0x251   :  { %v3051_v32 = vcombine.low %v3043_v29, %v3050_v31 }
 0x253   :  { %3063 = vst.msk [vmem:[#allocation8 + $0x18] sm:$0x3f] %vm3061_vm1, %v3051_v32 }
 0x254   :  { %4074 = shalt.err (!%p4071_p5)
}
 0x255   :  { %3073 = dma.vmem_to_hbm [thread:$0]  %s3071_s2, 480, %s4288_s3, [#allocation4]  }
 0x256   :  { %4087 = dma.done.wait [#allocation4], 480  }
 0x257   :  { %4088 = vsyncadd [#allocation4], 4294966816 }
 0x258   :  { %3077 = vsyncpa [#allocation3], 1 }
 0x259   :  { %3078 = vsyncpa [#allocation6], 1 }
 0x25a   :  { %3079 = vsyncpa [#allocation4], 1 }

</bundles_post_ra>
